<compile_context>
chip_gen: v7x
topology: tpu7x:2x2x1
jax: 0.10.0
libtpu: 0.0.40
codegen_flags: <defaults>
</compile_context>

<pallas_src>
import functools

import jax
import jax.numpy as jnp
from jax.experimental import pallas as pl
from jax.experimental.pallas import tpu as pltpu


# ----------------------------------------------------------------------------
# Single fused kernel: token_embedding -> concat(h) -> depth x TransformerBlock
#                      -> toprobs   (grid = (1,), everything resident in VMEM)
# ----------------------------------------------------------------------------
def _fused_kernel(
    x_ref, h_ref, emb_w_ref, emb_b_ref,
    wqkv_ref, wu_ref, bu_ref,
    g1_ref, be1_ref, w1_ref, b1_ref, w2_ref, b2_ref,
    g2_ref, be2_ref,
    top_w_ref, top_b_ref,
    logits_ref, tokens_ref,
    att_buf,
    *, b, tx, th, t, e, heads, depth,
):
    f32 = jnp.float32

    # ---- token embedding for all batch rows in one matmul -------------------
    emb_rows = (
        jnp.dot(x_ref[...], emb_w_ref[...], preferred_element_type=f32)
        + emb_b_ref[...]
    )                                                   # (b*tx, e)
    h_rows = h_ref[...]                                 # (b*th, e)

    # assemble tokens = cat(embed(x), h) in interleaved (b, t) row order,
    # written directly into the `tokens` output (also reused as activation)
    for bi in range(b):
        tokens_ref[bi * t:bi * t + tx, :] = emb_rows[bi * tx:(bi + 1) * tx, :]
        tokens_ref[bi * t + tx:bi * t + t, :] = h_rows[bi * th:(bi + 1) * th, :]

    xcur = tokens_ref[...]                              # (b*t, e)
    scale = float(e) ** -0.5                            # == (e**-0.25)**2

    # ---- depth transformer blocks, statically unrolled ----------------------
    for l in range(depth):
        # packed QKV projection for every row of every batch element
        qkv = jnp.dot(xcur, wqkv_ref[l], preferred_element_type=f32)

        # attention per (batch, head); head outputs packed along lanes
        for bi in range(b):
            r0, r1 = bi * t, (bi + 1) * t
            outs = []
            for hh in range(heads):
                q = qkv[r0:r1, hh * e:(hh + 1) * e]
                k = qkv[r0:r1, (heads + hh) * e:(heads + hh + 1) * e]
                v = qkv[r0:r1, (2 * heads + hh) * e:(2 * heads + hh + 1) * e]
                # q @ k.T without an explicit transpose
                s = jax.lax.dot_general(
                    q, k, (((1,), (1,)), ((), ())),
                    preferred_element_type=f32) * scale        # (t, t)
                s = s - jnp.max(s, axis=-1, keepdims=True)
                p = jnp.exp(s)
                p = p * pl.reciprocal(
                    jnp.sum(p, axis=-1, keepdims=True), approx=True)
                outs.append(jnp.dot(p, v, preferred_element_type=f32))
            att_buf[r0:r1, :] = jnp.concatenate(outs, axis=-1)   # (t, heads*e)

        # unify heads with a single matmul, add bias once, residual
        y = (jnp.dot(att_buf[...], wu_ref[l], preferred_element_type=f32)
             + bu_ref[l] + xcur)

        # LayerNorm 1 (eps=1e-5, biased variance — matches nn.LayerNorm)
        m1 = jnp.mean(y, axis=-1, keepdims=True)
        v1 = jnp.mean((y - m1) ** 2, axis=-1, keepdims=True)
        y = (y - m1) * jax.lax.rsqrt(v1 + 1e-5) * g1_ref[l] + be1_ref[l]

        # feed-forward: Linear -> ReLU -> Linear (all rows at once)
        hid = jnp.maximum(
            jnp.dot(y, w1_ref[l], preferred_element_type=f32) + b1_ref[l], 0.0)
        ff = jnp.dot(hid, w2_ref[l], preferred_element_type=f32) + b2_ref[l]
        z = ff + y

        # LayerNorm 2
        m2 = jnp.mean(z, axis=-1, keepdims=True)
        v2 = jnp.mean((z - m2) ** 2, axis=-1, keepdims=True)
        xcur = (z - m2) * jax.lax.rsqrt(v2 + 1e-5) * g2_ref[l] + be2_ref[l]

    # ---- toprobs: lane-dense (padded-to-128) output --------------------------
    logits_ref[...] = (
        jnp.dot(xcur, top_w_ref[...], preferred_element_type=f32)
        + top_b_ref[...]
    )


def _full_spec(a):
    n = a.ndim
    return pl.BlockSpec(a.shape, lambda i: (0,) * n)


# ----------------------------------------------------------------------------
# Wrapper: full Transformer forward (UPDeT agent)
#   returns (logits, tokens) like the PyTorch module
# ----------------------------------------------------------------------------
def transformer_forward(params, x, h, mask=None):
    # TODO(synk): non-None attention `mask` (masked_fill) path not implemented;
    # UPDeT always calls this transformer with mask=None.
    b, tx, din = x.shape
    _, th, e = h.shape
    t = tx + th
    heads = int(params["heads"])
    depth = params["wqkv"].shape[0]
    output_dim = params["top_w"].shape[1]
    out_pad = ((output_dim + 127) // 128) * 128

    # pad toprobs weights so the final store is lane-dense (128-wide)
    top_w_pad = jnp.zeros((e, out_pad), jnp.float32).at[:, :output_dim].set(
        params["top_w"])
    top_b_pad = jnp.zeros((1, out_pad), jnp.float32).at[:, :output_dim].set(
        params["top_b"])

    x_flat = x.reshape(b * tx, din).astype(jnp.float32)
    h_flat = h.reshape(b * th, e).astype(jnp.float32)

    inputs = (
        x_flat, h_flat,
        params["emb_w"], params["emb_b"],
        params["wqkv"], params["wu"], params["bu"],
        params["g1"], params["be1"],
        params["w1"], params["b1"], params["w2"], params["b2"],
        params["g2"], params["be2"],
        top_w_pad, top_b_pad,
    )

    kernel = functools.partial(
        _fused_kernel, b=b, tx=tx, th=th, t=t, e=e, heads=heads, depth=depth)

    logits_pad, tokens_flat = pl.pallas_call(
        kernel,
        out_shape=(
            jax.ShapeDtypeStruct((b * t, out_pad), jnp.float32),
            jax.ShapeDtypeStruct((b * t, e), jnp.float32),
        ),
        grid=(1,),
        in_specs=[_full_spec(a) for a in inputs],
        out_specs=(
            pl.BlockSpec((b * t, out_pad), lambda i: (0, 0)),
            pl.BlockSpec((b * t, e), lambda i: (0, 0)),
        ),
        scratch_shapes=[pltpu.VMEM((b * t, heads * e), jnp.float32)],
        compiler_params=pltpu.CompilerParams(
            dimension_semantics=("arbitrary",)),
    )(*inputs)

    logits = logits_pad[:, :output_dim].reshape(b, t, output_dim)
    tokens = tokens_flat.reshape(b, t, e)
    return logits, tokens


# ----------------------------------------------------------------------------
# Deterministic synthetic parameter init (weights stacked over depth)
# ----------------------------------------------------------------------------
def init_params(key, input_dim, emb, heads, depth, output_dim, ff_mult=4):
    ffh = ff_mult * emb
    ks = iter(jax.random.split(key, 8 + depth * 8))   # slack: unused keys OK
    rnd = lambda k, shape: jax.random.normal(k, shape, jnp.float32) * 0.1

    wqkv, wu, bu, w1, b1, w2, b2 = [], [], [], [], [], [], []
    g1, be1, g2, be2 = [], [], [], []
    for _ in range(depth):
        wqkv.append(rnd(next(ks), (emb, 3 * heads * emb)))
        wu.append(rnd(next(ks), (heads * emb, emb)))
        bu.append(rnd(next(ks), (1, emb)))
        w1.append(rnd(next(ks), (emb, ffh)))
        b1.append(rnd(next(ks), (1, ffh)))
        w2.append(rnd(next(ks), (ffh, emb)))
        b2.append(rnd(next(ks), (1, emb)))
        g1.append(jnp.ones((1, emb), jnp.float32))
        be1.append(jnp.zeros((1, emb), jnp.float32))
        g2.append(jnp.ones((1, emb), jnp.float32))
        be2.append(jnp.zeros((1, emb), jnp.float32))

    return {
        "heads": heads,
        "emb_w": rnd(next(ks), (input_dim, emb)),
        "emb_b": rnd(next(ks), (1, emb)),
        "top_w": rnd(next(ks), (emb, output_dim)),
        "top_b": rnd(next(ks), (1, output_dim)),
        "wqkv": jnp.stack(wqkv), "wu": jnp.stack(wu), "bu": jnp.stack(bu),
        "g1": jnp.stack(g1), "be1": jnp.stack(be1),
        "w1": jnp.stack(w1), "b1": jnp.stack(b1),
        "w2": jnp.stack(w2), "b2": jnp.stack(b2),
        "g2": jnp.stack(g2), "be2": jnp.stack(be2),
    }


# ----------------------------------------------------------------------------
# Pure-JAX reference for a correctness check
# ----------------------------------------------------------------------------
def _layernorm(x, g, b):
    m = jnp.mean(x, axis=-1, keepdims=True)
    v = jnp.mean((x - m) ** 2, axis=-1, keepdims=True)
    return (x - m) * jax.lax.rsqrt(v + 1e-5) * g + b


def reference_forward(params, x, h):
    b, tx, din = x.shape
    _, th, e = h.shape
    t = tx + th
    heads = int(params["heads"])
    depth = params["wqkv"].shape[0]

    tok = x.reshape(b * tx, din) @ params["emb_w"] + params["emb_b"]
    tokens = jnp.concatenate([tok.reshape(b, tx, e), h], axis=1)
    xc = tokens.reshape(b * t, e)
    for l in range(depth):
        qkv = xc @ params["wqkv"][l]
        heads_out = []
        for hh in range(heads):
            q = qkv[:, hh * e:(hh + 1) * e].reshape(b, t, e)
            k = qkv[:, (heads + hh) * e:(heads + hh + 1) * e].reshape(b, t, e)
            v = qkv[:, (2 * heads + hh) * e:(2 * heads + hh + 1) * e].reshape(b, t, e)
            s = jnp.einsum("bqe,bke->bqk", q, k) / jnp.sqrt(e)
            p = jax.nn.softmax(s, axis=-1)
            heads_out.append(jnp.einsum("bqk,bke->bqe", p, v))
        o = jnp.concatenate(heads_out, axis=-1).reshape(b * t, heads * e)
        y = _layernorm(o @ params["wu"][l] + params["bu"][l] + xc,
                       params["g1"][l], params["be1"][l])
        ff = (jnp.maximum(y @ params["w1"][l] + params["b1"][l], 0.0)
              @ params["w2"][l] + params["b2"][l])
        xc = _layernorm(ff + y, params["g2"][l], params["be2"][l])
    logits = (xc @ params["top_w"] + params["top_b"]).reshape(b, t, -1)
    return logits, tokens


if __name__ == "__main__":
    input_dim, emb, heads, depth, output_dim = 11, 32, 2, 2, 6
    b, tx = 2, 8                      # 8 entity tokens + 1 hidden-state token

    key = jax.random.PRNGKey(0)
    kp, kx, kh = jax.random.split(key, 3)
    params = init_params(kp, input_dim, emb, heads, depth, output_dim)

    x = jax.random.normal(kx, (b, tx, input_dim), jnp.float32)
    h = jax.random.normal(kh, (b, 1, emb), jnp.float32)

    logits, tokens = transformer_forward(params, x, h, mask=None)
    jax.block_until_ready((logits, tokens))
    assert logits.shape == (b, tx + 1, output_dim)
    assert tokens.shape == (b, tx + 1, emb)

    ref_logits, ref_tokens = reference_forward(params, x, h)
    assert float(jnp.max(jnp.abs(tokens - ref_tokens))) < 1e-4, "tokens mismatch"
    assert float(jnp.max(jnp.abs(logits - ref_logits))) < 2e-2, "logits mismatch"

    print("KERNEL_OK")
</pallas_src>

<mosaic_0001>
module attributes {stable_mosaic.version = 11 : i64} {
  func.func @_fused_kernel(%arg0: i32, %arg1: memref<16x11xf32, #tpu.memory_space<vmem>>, %arg2: memref<2x32xf32, #tpu.memory_space<vmem>>, %arg3: memref<11x32xf32, #tpu.memory_space<vmem>>, %arg4: memref<1x32xf32, #tpu.memory_space<vmem>>, %arg5: memref<2x32x192xf32, #tpu.memory_space<vmem>>, %arg6: memref<2x64x32xf32, #tpu.memory_space<vmem>>, %arg7: memref<2x1x32xf32, #tpu.memory_space<vmem>>, %arg8: memref<2x1x32xf32, #tpu.memory_space<vmem>>, %arg9: memref<2x1x32xf32, #tpu.memory_space<vmem>>, %arg10: memref<2x32x128xf32, #tpu.memory_space<vmem>>, %arg11: memref<2x1x128xf32, #tpu.memory_space<vmem>>, %arg12: memref<2x128x32xf32, #tpu.memory_space<vmem>>, %arg13: memref<2x1x32xf32, #tpu.memory_space<vmem>>, %arg14: memref<2x1x32xf32, #tpu.memory_space<vmem>>, %arg15: memref<2x1x32xf32, #tpu.memory_space<vmem>>, %arg16: memref<32x128xf32, #tpu.memory_space<vmem>>, %arg17: memref<1x128xf32, #tpu.memory_space<vmem>>, %arg18: memref<18x128xf32, #tpu.memory_space<vmem>>, %arg19: memref<18x32xf32, #tpu.memory_space<vmem>>, %arg20: memref<18x64xf32, #tpu.memory_space<vmem>>) attributes {dimension_semantics = [#tpu.dimension_semantics<arbitrary>], iteration_bounds = array<i64: 1>, scalar_prefetch = 0 : i64, scratch_operands = 1 : i64, tpu.core_type = #tpu.core_type<tc>, window_params = [{pipeline_mode = #tpu.pipeline_mode<synchronous>, transform_indices = @transform_0, window_bounds = array<i64: 16, 11>}, {pipeline_mode = #tpu.pipeline_mode<synchronous>, transform_indices = @transform_1, window_bounds = array<i64: 2, 32>}, {pipeline_mode = #tpu.pipeline_mode<synchronous>, transform_indices = @transform_2, window_bounds = array<i64: 11, 32>}, {pipeline_mode = #tpu.pipeline_mode<synchronous>, transform_indices = @transform_3, window_bounds = array<i64: 1, 32>}, {pipeline_mode = #tpu.pipeline_mode<synchronous>, transform_indices = @transform_4, window_bounds = array<i64: 2, 32, 192>}, {pipeline_mode = #tpu.pipeline_mode<synchronous>, transform_indices = @transform_5, window_bounds = array<i64: 2, 64, 32>}, {pipeline_mode = #tpu.pipeline_mode<synchronous>, transform_indices = @transform_6, window_bounds = array<i64: 2, 1, 32>}, {pipeline_mode = #tpu.pipeline_mode<synchronous>, transform_indices = @transform_7, window_bounds = array<i64: 2, 1, 32>}, {pipeline_mode = #tpu.pipeline_mode<synchronous>, transform_indices = @transform_8, window_bounds = array<i64: 2, 1, 32>}, {pipeline_mode = #tpu.pipeline_mode<synchronous>, transform_indices = @transform_9, window_bounds = array<i64: 2, 32, 128>}, {pipeline_mode = #tpu.pipeline_mode<synchronous>, transform_indices = @transform_10, window_bounds = array<i64: 2, 1, 128>}, {pipeline_mode = #tpu.pipeline_mode<synchronous>, transform_indices = @transform_11, window_bounds = array<i64: 2, 128, 32>}, {pipeline_mode = #tpu.pipeline_mode<synchronous>, transform_indices = @transform_12, window_bounds = array<i64: 2, 1, 32>}, {pipeline_mode = #tpu.pipeline_mode<synchronous>, transform_indices = @transform_13, window_bounds = array<i64: 2, 1, 32>}, {pipeline_mode = #tpu.pipeline_mode<synchronous>, transform_indices = @transform_14, window_bounds = array<i64: 2, 1, 32>}, {pipeline_mode = #tpu.pipeline_mode<synchronous>, transform_indices = @transform_15, window_bounds = array<i64: 32, 128>}, {pipeline_mode = #tpu.pipeline_mode<synchronous>, transform_indices = @transform_16, window_bounds = array<i64: 1, 128>}, {pipeline_mode = #tpu.pipeline_mode<synchronous>, transform_indices = @transform_17, window_bounds = array<i64: 18, 128>}, {pipeline_mode = #tpu.pipeline_mode<synchronous>, transform_indices = @transform_18, window_bounds = array<i64: 18, 32>}]} {
    %c0 = arith.constant 0 : index
    %c0_0 = arith.constant 0 : index
    %0 = vector.load %arg1[%c0, %c0_0] : memref<16x11xf32, #tpu.memory_space<vmem>>, vector<16x11xf32>
    %c0_1 = arith.constant 0 : index
    %c0_2 = arith.constant 0 : index
    %1 = vector.load %arg3[%c0_1, %c0_2] : memref<11x32xf32, #tpu.memory_space<vmem>>, vector<11x32xf32>
    %cst = arith.constant dense<0.000000e+00> : vector<16x32xf32>
    %2 = tpu.matmul %0, %1, %cst {dimension_numbers = #tpu.dot_dimension_numbers<[1], [0], [0], [1], [0, 0, 1, 1], [], []>} : vector<16x11xf32>, vector<11x32xf32>, vector<16x32xf32> -> vector<16x32xf32>
    %c0_3 = arith.constant 0 : index
    %c0_4 = arith.constant 0 : index
    %3 = vector.load %arg4[%c0_3, %c0_4] : memref<1x32xf32, #tpu.memory_space<vmem>>, vector<1x32xf32>
    %4 = vector.broadcast %3 : vector<1x32xf32> to vector<16x32xf32>
    %5 = arith.addf %2, %4 : vector<16x32xf32>
    %c0_5 = arith.constant 0 : index
    %c0_6 = arith.constant 0 : index
    %6 = vector.load %arg2[%c0_5, %c0_6] : memref<2x32xf32, #tpu.memory_space<vmem>>, vector<2x32xf32>
    %7 = vector.extract_strided_slice %5 {offsets = [0, 0], sizes = [8, 32], strides = [1, 1]} : vector<16x32xf32> to vector<8x32xf32>
    %c0_7 = arith.constant 0 : index
    %c0_8 = arith.constant 0 : index
    %8 = vector.load %arg19[%c0_7, %c0_8] : memref<18x32xf32, #tpu.memory_space<vmem>>, vector<8x32xf32>
    tpu.vector_store %arg19[%c0_7, %c0_8], %7 {strides = array<i32>} : memref<18x32xf32, #tpu.memory_space<vmem>>, vector<8x32xf32>,
    %9 = vector.extract_strided_slice %6 {offsets = [0, 0], sizes = [1, 32], strides = [1, 1]} : vector<2x32xf32> to vector<1x32xf32>
    %c8 = arith.constant 8 : index
    %c0_9 = arith.constant 0 : index
    %10 = vector.load %arg19[%c8, %c0_9] : memref<18x32xf32, #tpu.memory_space<vmem>>, vector<1x32xf32>
    tpu.vector_store %arg19[%c8, %c0_9], %9 {strides = array<i32>} : memref<18x32xf32, #tpu.memory_space<vmem>>, vector<1x32xf32>,
    %11 = vector.extract_strided_slice %5 {offsets = [8, 0], sizes = [8, 32], strides = [1, 1]} : vector<16x32xf32> to vector<8x32xf32>
    %c9 = arith.constant 9 : index
    %c0_10 = arith.constant 0 : index
    %12 = vector.load %arg19[%c9, %c0_10] : memref<18x32xf32, #tpu.memory_space<vmem>>, vector<8x32xf32>
    tpu.vector_store %arg19[%c9, %c0_10], %11 {strides = array<i32>} : memref<18x32xf32, #tpu.memory_space<vmem>>, vector<8x32xf32>,
    %13 = vector.extract_strided_slice %6 {offsets = [1, 0], sizes = [1, 32], strides = [1, 1]} : vector<2x32xf32> to vector<1x32xf32>
    %c17 = arith.constant 17 : index
    %c0_11 = arith.constant 0 : index
    %14 = vector.load %arg19[%c17, %c0_11] : memref<18x32xf32, #tpu.memory_space<vmem>>, vector<1x32xf32>
    tpu.vector_store %arg19[%c17, %c0_11], %13 {strides = array<i32>} : memref<18x32xf32, #tpu.memory_space<vmem>>, vector<1x32xf32>,
    %c0_12 = arith.constant 0 : index
    %c0_13 = arith.constant 0 : index
    %15 = vector.load %arg19[%c0_12, %c0_13] : memref<18x32xf32, #tpu.memory_space<vmem>>, vector<18x32xf32>
    %c0_14 = arith.constant 0 : index
    %c0_15 = arith.constant 0 : index
    %c0_16 = arith.constant 0 : index
    %16 = vector.load %arg5[%c0_14, %c0_15, %c0_16] : memref<2x32x192xf32, #tpu.memory_space<vmem>>, vector<1x32x192xf32>
    %17 = vector.shape_cast %16 : vector<1x32x192xf32> to vector<32x192xf32>
    %cst_17 = arith.constant dense<0.000000e+00> : vector<18x192xf32>
    %18 = tpu.matmul %15, %17, %cst_17 {dimension_numbers = #tpu.dot_dimension_numbers<[1], [0], [0], [1], [0, 0, 1, 1], [], []>} : vector<18x32xf32>, vector<32x192xf32>, vector<18x192xf32> -> vector<18x192xf32>
    %19 = vector.extract_strided_slice %18 {offsets = [0, 0], sizes = [9, 32], strides = [1, 1]} : vector<18x192xf32> to vector<9x32xf32>
    %20 = vector.extract_strided_slice %18 {offsets = [0, 64], sizes = [9, 32], strides = [1, 1]} : vector<18x192xf32> to vector<9x32xf32>
    %21 = vector.extract_strided_slice %18 {offsets = [0, 128], sizes = [9, 32], strides = [1, 1]} : vector<18x192xf32> to vector<9x32xf32>
    %cst_18 = arith.constant dense<0.000000e+00> : vector<9x9xf32>
    %22 = tpu.matmul %19, %20, %cst_18 {dimension_numbers = #tpu.dot_dimension_numbers<[1], [1], [0], [0], [0, 0, 1, 0], [], []>} : vector<9x32xf32>, vector<9x32xf32>, vector<9x9xf32> -> vector<9x9xf32>
    %cst_19 = arith.constant 0.176776692 : f32
    %23 = vector.broadcast %cst_19 : f32 to vector<9x9xf32>
    %24 = arith.mulf %22, %23 : vector<9x9xf32>
    %cst_20 = arith.constant dense<0xFF800000> : vector<9xf32>
    %25 = vector.multi_reduction <maximumf>, %24, %cst_20 [1] : vector<9x9xf32> to vector<9xf32>
    %26 = vector.shape_cast %25 : vector<9xf32> to vector<9x1xf32>
    %27 = vector.broadcast %26 : vector<9x1xf32> to vector<9x9xf32>
    %28 = arith.subf %24, %27 : vector<9x9xf32>
    %29 = math.exp %28 : vector<9x9xf32>
    %cst_21 = arith.constant dense<0.000000e+00> : vector<9xf32>
    %30 = vector.multi_reduction <add>, %29, %cst_21 [1] : vector<9x9xf32> to vector<9xf32>
    %31 = vector.shape_cast %30 : vector<9xf32> to vector<9x1xf32>
    %32 = tpu.reciprocal %31 {approx = true} : vector<9x1xf32> -> vector<9x1xf32>
    %33 = vector.broadcast %32 : vector<9x1xf32> to vector<9x9xf32>
    %34 = arith.mulf %29, %33 : vector<9x9xf32>
    %cst_22 = arith.constant dense<0.000000e+00> : vector<9x32xf32>
    %35 = tpu.matmul %34, %21, %cst_22 {dimension_numbers = #tpu.dot_dimension_numbers<[1], [0], [0], [1], [0, 0, 1, 1], [], []>} : vector<9x9xf32>, vector<9x32xf32>, vector<9x32xf32> -> vector<9x32xf32>
    %36 = vector.extract_strided_slice %18 {offsets = [0, 32], sizes = [9, 32], strides = [1, 1]} : vector<18x192xf32> to vector<9x32xf32>
    %37 = vector.extract_strided_slice %18 {offsets = [0, 96], sizes = [9, 32], strides = [1, 1]} : vector<18x192xf32> to vector<9x32xf32>
    %38 = vector.extract_strided_slice %18 {offsets = [0, 160], sizes = [9, 32], strides = [1, 1]} : vector<18x192xf32> to vector<9x32xf32>
    %cst_23 = arith.constant dense<0.000000e+00> : vector<9x9xf32>
    %39 = tpu.matmul %36, %37, %cst_23 {dimension_numbers = #tpu.dot_dimension_numbers<[1], [1], [0], [0], [0, 0, 1, 0], [], []>} : vector<9x32xf32>, vector<9x32xf32>, vector<9x9xf32> -> vector<9x9xf32>
    %cst_24 = arith.constant 0.176776692 : f32
    %40 = vector.broadcast %cst_24 : f32 to vector<9x9xf32>
    %41 = arith.mulf %39, %40 : vector<9x9xf32>
    %cst_25 = arith.constant dense<0xFF800000> : vector<9xf32>
    %42 = vector.multi_reduction <maximumf>, %41, %cst_25 [1] : vector<9x9xf32> to vector<9xf32>
    %43 = vector.shape_cast %42 : vector<9xf32> to vector<9x1xf32>
    %44 = vector.broadcast %43 : vector<9x1xf32> to vector<9x9xf32>
    %45 = arith.subf %41, %44 : vector<9x9xf32>
    %46 = math.exp %45 : vector<9x9xf32>
    %cst_26 = arith.constant dense<0.000000e+00> : vector<9xf32>
    %47 = vector.multi_reduction <add>, %46, %cst_26 [1] : vector<9x9xf32> to vector<9xf32>
    %48 = vector.shape_cast %47 : vector<9xf32> to vector<9x1xf32>
    %49 = tpu.reciprocal %48 {approx = true} : vector<9x1xf32> -> vector<9x1xf32>
    %50 = vector.broadcast %49 : vector<9x1xf32> to vector<9x9xf32>
    %51 = arith.mulf %46, %50 : vector<9x9xf32>
    %cst_27 = arith.constant dense<0.000000e+00> : vector<9x32xf32>
    %52 = tpu.matmul %51, %38, %cst_27 {dimension_numbers = #tpu.dot_dimension_numbers<[1], [0], [0], [1], [0, 0, 1, 1], [], []>} : vector<9x9xf32>, vector<9x32xf32>, vector<9x32xf32> -> vector<9x32xf32>
    %53 = tpu.concatenate %35, %52 in 1 : vector<9x32xf32>, vector<9x32xf32> -> vector<9x64xf32>
    %c0_28 = arith.constant 0 : index
    %c0_29 = arith.constant 0 : index
    %54 = vector.load %arg20[%c0_28, %c0_29] : memref<18x64xf32, #tpu.memory_space<vmem>>, vector<9x64xf32>
    tpu.vector_store %arg20[%c0_28, %c0_29], %53 {strides = array<i32>} : memref<18x64xf32, #tpu.memory_space<vmem>>, vector<9x64xf32>,
    %55 = vector.extract_strided_slice %18 {offsets = [9, 0], sizes = [9, 32], strides = [1, 1]} : vector<18x192xf32> to vector<9x32xf32>
    %56 = vector.extract_strided_slice %18 {offsets = [9, 64], sizes = [9, 32], strides = [1, 1]} : vector<18x192xf32> to vector<9x32xf32>
    %57 = vector.extract_strided_slice %18 {offsets = [9, 128], sizes = [9, 32], strides = [1, 1]} : vector<18x192xf32> to vector<9x32xf32>
    %cst_30 = arith.constant dense<0.000000e+00> : vector<9x9xf32>
    %58 = tpu.matmul %55, %56, %cst_30 {dimension_numbers = #tpu.dot_dimension_numbers<[1], [1], [0], [0], [0, 0, 1, 0], [], []>} : vector<9x32xf32>, vector<9x32xf32>, vector<9x9xf32> -> vector<9x9xf32>
    %cst_31 = arith.constant 0.176776692 : f32
    %59 = vector.broadcast %cst_31 : f32 to vector<9x9xf32>
    %60 = arith.mulf %58, %59 : vector<9x9xf32>
    %cst_32 = arith.constant dense<0xFF800000> : vector<9xf32>
    %61 = vector.multi_reduction <maximumf>, %60, %cst_32 [1] : vector<9x9xf32> to vector<9xf32>
    %62 = vector.shape_cast %61 : vector<9xf32> to vector<9x1xf32>
    %63 = vector.broadcast %62 : vector<9x1xf32> to vector<9x9xf32>
    %64 = arith.subf %60, %63 : vector<9x9xf32>
    %65 = math.exp %64 : vector<9x9xf32>
    %cst_33 = arith.constant dense<0.000000e+00> : vector<9xf32>
    %66 = vector.multi_reduction <add>, %65, %cst_33 [1] : vector<9x9xf32> to vector<9xf32>
    %67 = vector.shape_cast %66 : vector<9xf32> to vector<9x1xf32>
    %68 = tpu.reciprocal %67 {approx = true} : vector<9x1xf32> -> vector<9x1xf32>
    %69 = vector.broadcast %68 : vector<9x1xf32> to vector<9x9xf32>
    %70 = arith.mulf %65, %69 : vector<9x9xf32>
    %cst_34 = arith.constant dense<0.000000e+00> : vector<9x32xf32>
    %71 = tpu.matmul %70, %57, %cst_34 {dimension_numbers = #tpu.dot_dimension_numbers<[1], [0], [0], [1], [0, 0, 1, 1], [], []>} : vector<9x9xf32>, vector<9x32xf32>, vector<9x32xf32> -> vector<9x32xf32>
    %72 = vector.extract_strided_slice %18 {offsets = [9, 32], sizes = [9, 32], strides = [1, 1]} : vector<18x192xf32> to vector<9x32xf32>
    %73 = vector.extract_strided_slice %18 {offsets = [9, 96], sizes = [9, 32], strides = [1, 1]} : vector<18x192xf32> to vector<9x32xf32>
    %74 = vector.extract_strided_slice %18 {offsets = [9, 160], sizes = [9, 32], strides = [1, 1]} : vector<18x192xf32> to vector<9x32xf32>
    %cst_35 = arith.constant dense<0.000000e+00> : vector<9x9xf32>
    %75 = tpu.matmul %72, %73, %cst_35 {dimension_numbers = #tpu.dot_dimension_numbers<[1], [1], [0], [0], [0, 0, 1, 0], [], []>} : vector<9x32xf32>, vector<9x32xf32>, vector<9x9xf32> -> vector<9x9xf32>
    %cst_36 = arith.constant 0.176776692 : f32
    %76 = vector.broadcast %cst_36 : f32 to vector<9x9xf32>
    %77 = arith.mulf %75, %76 : vector<9x9xf32>
    %cst_37 = arith.constant dense<0xFF800000> : vector<9xf32>
    %78 = vector.multi_reduction <maximumf>, %77, %cst_37 [1] : vector<9x9xf32> to vector<9xf32>
    %79 = vector.shape_cast %78 : vector<9xf32> to vector<9x1xf32>
    %80 = vector.broadcast %79 : vector<9x1xf32> to vector<9x9xf32>
    %81 = arith.subf %77, %80 : vector<9x9xf32>
    %82 = math.exp %81 : vector<9x9xf32>
    %cst_38 = arith.constant dense<0.000000e+00> : vector<9xf32>
    %83 = vector.multi_reduction <add>, %82, %cst_38 [1] : vector<9x9xf32> to vector<9xf32>
    %84 = vector.shape_cast %83 : vector<9xf32> to vector<9x1xf32>
    %85 = tpu.reciprocal %84 {approx = true} : vector<9x1xf32> -> vector<9x1xf32>
    %86 = vector.broadcast %85 : vector<9x1xf32> to vector<9x9xf32>
    %87 = arith.mulf %82, %86 : vector<9x9xf32>
    %cst_39 = arith.constant dense<0.000000e+00> : vector<9x32xf32>
    %88 = tpu.matmul %87, %74, %cst_39 {dimension_numbers = #tpu.dot_dimension_numbers<[1], [0], [0], [1], [0, 0, 1, 1], [], []>} : vector<9x9xf32>, vector<9x32xf32>, vector<9x32xf32> -> vector<9x32xf32>
    %89 = tpu.concatenate %71, %88 in 1 : vector<9x32xf32>, vector<9x32xf32> -> vector<9x64xf32>
    %c9_40 = arith.constant 9 : index
    %c0_41 = arith.constant 0 : index
    %90 = vector.load %arg20[%c9_40, %c0_41] : memref<18x64xf32, #tpu.memory_space<vmem>>, vector<9x64xf32>
    tpu.vector_store %arg20[%c9_40, %c0_41], %89 {strides = array<i32>} : memref<18x64xf32, #tpu.memory_space<vmem>>, vector<9x64xf32>,
    %c0_42 = arith.constant 0 : index
    %c0_43 = arith.constant 0 : index
    %91 = vector.load %arg20[%c0_42, %c0_43] : memref<18x64xf32, #tpu.memory_space<vmem>>, vector<18x64xf32>
    %c0_44 = arith.constant 0 : index
    %c0_45 = arith.constant 0 : index
    %c0_46 = arith.constant 0 : index
    %92 = vector.load %arg6[%c0_44, %c0_45, %c0_46] : memref<2x64x32xf32, #tpu.memory_space<vmem>>, vector<1x64x32xf32>
    %93 = vector.shape_cast %92 : vector<1x64x32xf32> to vector<64x32xf32>
    %cst_47 = arith.constant dense<0.000000e+00> : vector<18x32xf32>
    %94 = tpu.matmul %91, %93, %cst_47 {dimension_numbers = #tpu.dot_dimension_numbers<[1], [0], [0], [1], [0, 0, 1, 1], [], []>} : vector<18x64xf32>, vector<64x32xf32>, vector<18x32xf32> -> vector<18x32xf32>
    %c0_48 = arith.constant 0 : index
    %c0_49 = arith.constant 0 : index
    %c0_50 = arith.constant 0 : index
    %95 = vector.load %arg7[%c0_48, %c0_49, %c0_50] : memref<2x1x32xf32, #tpu.memory_space<vmem>>, vector<1x1x32xf32>
    %96 = vector.shape_cast %95 : vector<1x1x32xf32> to vector<1x32xf32>
    %97 = vector.broadcast %96 : vector<1x32xf32> to vector<18x32xf32>
    %98 = arith.addf %94, %97 : vector<18x32xf32>
    %99 = arith.addf %98, %15 : vector<18x32xf32>
    %cst_51 = arith.constant dense<0.000000e+00> : vector<18xf32>
    %100 = vector.multi_reduction <add>, %99, %cst_51 [1] : vector<18x32xf32> to vector<18xf32>
    %101 = vector.shape_cast %100 : vector<18xf32> to vector<18x1xf32>
    %cst_52 = arith.constant 3.200000e+01 : f32
    %102 = vector.broadcast %cst_52 : f32 to vector<18x1xf32>
    %103 = arith.divf %101, %102 : vector<18x1xf32>
    %104 = vector.broadcast %103 : vector<18x1xf32> to vector<18x32xf32>
    %105 = arith.subf %99, %104 : vector<18x32xf32>
    %106 = arith.mulf %105, %105 : vector<18x32xf32>
    %cst_53 = arith.constant dense<0.000000e+00> : vector<18xf32>
    %107 = vector.multi_reduction <add>, %106, %cst_53 [1] : vector<18x32xf32> to vector<18xf32>
    %108 = vector.shape_cast %107 : vector<18xf32> to vector<18x1xf32>
    %cst_54 = arith.constant 3.200000e+01 : f32
    %109 = vector.broadcast %cst_54 : f32 to vector<18x1xf32>
    %110 = arith.divf %108, %109 : vector<18x1xf32>
    %111 = vector.broadcast %103 : vector<18x1xf32> to vector<18x32xf32>
    %112 = arith.subf %99, %111 : vector<18x32xf32>
    %cst_55 = arith.constant 9.99999974E-6 : f32
    %113 = vector.broadcast %cst_55 : f32 to vector<18x1xf32>
    %114 = arith.addf %110, %113 : vector<18x1xf32>
    %115 = math.rsqrt %114 : vector<18x1xf32>
    %116 = vector.broadcast %115 : vector<18x1xf32> to vector<18x32xf32>
    %117 = arith.mulf %112, %116 : vector<18x32xf32>
    %c0_56 = arith.constant 0 : index
    %c0_57 = arith.constant 0 : index
    %c0_58 = arith.constant 0 : index
    %118 = vector.load %arg8[%c0_56, %c0_57, %c0_58] : memref<2x1x32xf32, #tpu.memory_space<vmem>>, vector<1x1x32xf32>
    %119 = vector.shape_cast %118 : vector<1x1x32xf32> to vector<1x32xf32>
    %120 = vector.broadcast %119 : vector<1x32xf32> to vector<18x32xf32>
    %121 = arith.mulf %117, %120 : vector<18x32xf32>
    %c0_59 = arith.constant 0 : index
    %c0_60 = arith.constant 0 : index
    %c0_61 = arith.constant 0 : index
    %122 = vector.load %arg9[%c0_59, %c0_60, %c0_61] : memref<2x1x32xf32, #tpu.memory_space<vmem>>, vector<1x1x32xf32>
    %123 = vector.shape_cast %122 : vector<1x1x32xf32> to vector<1x32xf32>
    %124 = vector.broadcast %123 : vector<1x32xf32> to vector<18x32xf32>
    %125 = arith.addf %121, %124 : vector<18x32xf32>
    %c0_62 = arith.constant 0 : index
    %c0_63 = arith.constant 0 : index
    %c0_64 = arith.constant 0 : index
    %126 = vector.load %arg10[%c0_62, %c0_63, %c0_64] : memref<2x32x128xf32, #tpu.memory_space<vmem>>, vector<1x32x128xf32>
    %127 = vector.shape_cast %126 : vector<1x32x128xf32> to vector<32x128xf32>
    %cst_65 = arith.constant dense<0.000000e+00> : vector<18x128xf32>
    %128 = tpu.matmul %125, %127, %cst_65 {dimension_numbers = #tpu.dot_dimension_numbers<[1], [0], [0], [1], [0, 0, 1, 1], [], []>} : vector<18x32xf32>, vector<32x128xf32>, vector<18x128xf32> -> vector<18x128xf32>
    %c0_66 = arith.constant 0 : index
    %c0_67 = arith.constant 0 : index
    %c0_68 = arith.constant 0 : index
    %129 = vector.load %arg11[%c0_66, %c0_67, %c0_68] : memref<2x1x128xf32, #tpu.memory_space<vmem>>, vector<1x1x128xf32>
    %130 = vector.shape_cast %129 : vector<1x1x128xf32> to vector<1x128xf32>
    %131 = vector.broadcast %130 : vector<1x128xf32> to vector<18x128xf32>
    %132 = arith.addf %128, %131 : vector<18x128xf32>
    %cst_69 = arith.constant 0.000000e+00 : f32
    %133 = vector.broadcast %cst_69 : f32 to vector<18x128xf32>
    %134 = arith.maximumf %132, %133 : vector<18x128xf32>
    %c0_70 = arith.constant 0 : index
    %c0_71 = arith.constant 0 : index
    %c0_72 = arith.constant 0 : index
    %135 = vector.load %arg12[%c0_70, %c0_71, %c0_72] : memref<2x128x32xf32, #tpu.memory_space<vmem>>, vector<1x128x32xf32>
    %136 = vector.shape_cast %135 : vector<1x128x32xf32> to vector<128x32xf32>
    %cst_73 = arith.constant dense<0.000000e+00> : vector<18x32xf32>
    %137 = tpu.matmul %134, %136, %cst_73 {dimension_numbers = #tpu.dot_dimension_numbers<[1], [0], [0], [1], [0, 0, 1, 1], [], []>} : vector<18x128xf32>, vector<128x32xf32>, vector<18x32xf32> -> vector<18x32xf32>
    %c0_74 = arith.constant 0 : index
    %c0_75 = arith.constant 0 : index
    %c0_76 = arith.constant 0 : index
    %138 = vector.load %arg13[%c0_74, %c0_75, %c0_76] : memref<2x1x32xf32, #tpu.memory_space<vmem>>, vector<1x1x32xf32>
    %139 = vector.shape_cast %138 : vector<1x1x32xf32> to vector<1x32xf32>
    %140 = vector.broadcast %139 : vector<1x32xf32> to vector<18x32xf32>
    %141 = arith.addf %137, %140 : vector<18x32xf32>
    %142 = arith.addf %141, %125 : vector<18x32xf32>
    %cst_77 = arith.constant dense<0.000000e+00> : vector<18xf32>
    %143 = vector.multi_reduction <add>, %142, %cst_77 [1] : vector<18x32xf32> to vector<18xf32>
    %144 = vector.shape_cast %143 : vector<18xf32> to vector<18x1xf32>
    %cst_78 = arith.constant 3.200000e+01 : f32
    %145 = vector.broadcast %cst_78 : f32 to vector<18x1xf32>
    %146 = arith.divf %144, %145 : vector<18x1xf32>
    %147 = vector.broadcast %146 : vector<18x1xf32> to vector<18x32xf32>
    %148 = arith.subf %142, %147 : vector<18x32xf32>
    %149 = arith.mulf %148, %148 : vector<18x32xf32>
    %cst_79 = arith.constant dense<0.000000e+00> : vector<18xf32>
    %150 = vector.multi_reduction <add>, %149, %cst_79 [1] : vector<18x32xf32> to vector<18xf32>
    %151 = vector.shape_cast %150 : vector<18xf32> to vector<18x1xf32>
    %cst_80 = arith.constant 3.200000e+01 : f32
    %152 = vector.broadcast %cst_80 : f32 to vector<18x1xf32>
    %153 = arith.divf %151, %152 : vector<18x1xf32>
    %154 = vector.broadcast %146 : vector<18x1xf32> to vector<18x32xf32>
    %155 = arith.subf %142, %154 : vector<18x32xf32>
    %cst_81 = arith.constant 9.99999974E-6 : f32
    %156 = vector.broadcast %cst_81 : f32 to vector<18x1xf32>
    %157 = arith.addf %153, %156 : vector<18x1xf32>
    %158 = math.rsqrt %157 : vector<18x1xf32>
    %159 = vector.broadcast %158 : vector<18x1xf32> to vector<18x32xf32>
    %160 = arith.mulf %155, %159 : vector<18x32xf32>
    %c0_82 = arith.constant 0 : index
    %c0_83 = arith.constant 0 : index
    %c0_84 = arith.constant 0 : index
    %161 = vector.load %arg14[%c0_82, %c0_83, %c0_84] : memref<2x1x32xf32, #tpu.memory_space<vmem>>, vector<1x1x32xf32>
    %162 = vector.shape_cast %161 : vector<1x1x32xf32> to vector<1x32xf32>
    %163 = vector.broadcast %162 : vector<1x32xf32> to vector<18x32xf32>
    %164 = arith.mulf %160, %163 : vector<18x32xf32>
    %c0_85 = arith.constant 0 : index
    %c0_86 = arith.constant 0 : index
    %c0_87 = arith.constant 0 : index
    %165 = vector.load %arg15[%c0_85, %c0_86, %c0_87] : memref<2x1x32xf32, #tpu.memory_space<vmem>>, vector<1x1x32xf32>
    %166 = vector.shape_cast %165 : vector<1x1x32xf32> to vector<1x32xf32>
    %167 = vector.broadcast %166 : vector<1x32xf32> to vector<18x32xf32>
    %168 = arith.addf %164, %167 : vector<18x32xf32>
    %c1 = arith.constant 1 : index
    %c0_88 = arith.constant 0 : index
    %c0_89 = arith.constant 0 : index
    %169 = vector.load %arg5[%c1, %c0_88, %c0_89] : memref<2x32x192xf32, #tpu.memory_space<vmem>>, vector<1x32x192xf32>
    %170 = vector.shape_cast %169 : vector<1x32x192xf32> to vector<32x192xf32>
    %cst_90 = arith.constant dense<0.000000e+00> : vector<18x192xf32>
    %171 = tpu.matmul %168, %170, %cst_90 {dimension_numbers = #tpu.dot_dimension_numbers<[1], [0], [0], [1], [0, 0, 1, 1], [], []>} : vector<18x32xf32>, vector<32x192xf32>, vector<18x192xf32> -> vector<18x192xf32>
    %172 = vector.extract_strided_slice %171 {offsets = [0, 0], sizes = [9, 32], strides = [1, 1]} : vector<18x192xf32> to vector<9x32xf32>
    %173 = vector.extract_strided_slice %171 {offsets = [0, 64], sizes = [9, 32], strides = [1, 1]} : vector<18x192xf32> to vector<9x32xf32>
    %174 = vector.extract_strided_slice %171 {offsets = [0, 128], sizes = [9, 32], strides = [1, 1]} : vector<18x192xf32> to vector<9x32xf32>
    %cst_91 = arith.constant dense<0.000000e+00> : vector<9x9xf32>
    %175 = tpu.matmul %172, %173, %cst_91 {dimension_numbers = #tpu.dot_dimension_numbers<[1], [1], [0], [0], [0, 0, 1, 0], [], []>} : vector<9x32xf32>, vector<9x32xf32>, vector<9x9xf32> -> vector<9x9xf32>
    %cst_92 = arith.constant 0.176776692 : f32
    %176 = vector.broadcast %cst_92 : f32 to vector<9x9xf32>
    %177 = arith.mulf %175, %176 : vector<9x9xf32>
    %cst_93 = arith.constant dense<0xFF800000> : vector<9xf32>
    %178 = vector.multi_reduction <maximumf>, %177, %cst_93 [1] : vector<9x9xf32> to vector<9xf32>
    %179 = vector.shape_cast %178 : vector<9xf32> to vector<9x1xf32>
    %180 = vector.broadcast %179 : vector<9x1xf32> to vector<9x9xf32>
    %181 = arith.subf %177, %180 : vector<9x9xf32>
    %182 = math.exp %181 : vector<9x9xf32>
    %cst_94 = arith.constant dense<0.000000e+00> : vector<9xf32>
    %183 = vector.multi_reduction <add>, %182, %cst_94 [1] : vector<9x9xf32> to vector<9xf32>
    %184 = vector.shape_cast %183 : vector<9xf32> to vector<9x1xf32>
    %185 = tpu.reciprocal %184 {approx = true} : vector<9x1xf32> -> vector<9x1xf32>
    %186 = vector.broadcast %185 : vector<9x1xf32> to vector<9x9xf32>
    %187 = arith.mulf %182, %186 : vector<9x9xf32>
    %cst_95 = arith.constant dense<0.000000e+00> : vector<9x32xf32>
    %188 = tpu.matmul %187, %174, %cst_95 {dimension_numbers = #tpu.dot_dimension_numbers<[1], [0], [0], [1], [0, 0, 1, 1], [], []>} : vector<9x9xf32>, vector<9x32xf32>, vector<9x32xf32> -> vector<9x32xf32>
    %189 = vector.extract_strided_slice %171 {offsets = [0, 32], sizes = [9, 32], strides = [1, 1]} : vector<18x192xf32> to vector<9x32xf32>
    %190 = vector.extract_strided_slice %171 {offsets = [0, 96], sizes = [9, 32], strides = [1, 1]} : vector<18x192xf32> to vector<9x32xf32>
    %191 = vector.extract_strided_slice %171 {offsets = [0, 160], sizes = [9, 32], strides = [1, 1]} : vector<18x192xf32> to vector<9x32xf32>
    %cst_96 = arith.constant dense<0.000000e+00> : vector<9x9xf32>
    %192 = tpu.matmul %189, %190, %cst_96 {dimension_numbers = #tpu.dot_dimension_numbers<[1], [1], [0], [0], [0, 0, 1, 0], [], []>} : vector<9x32xf32>, vector<9x32xf32>, vector<9x9xf32> -> vector<9x9xf32>
    %cst_97 = arith.constant 0.176776692 : f32
    %193 = vector.broadcast %cst_97 : f32 to vector<9x9xf32>
    %194 = arith.mulf %192, %193 : vector<9x9xf32>
    %cst_98 = arith.constant dense<0xFF800000> : vector<9xf32>
    %195 = vector.multi_reduction <maximumf>, %194, %cst_98 [1] : vector<9x9xf32> to vector<9xf32>
    %196 = vector.shape_cast %195 : vector<9xf32> to vector<9x1xf32>
    %197 = vector.broadcast %196 : vector<9x1xf32> to vector<9x9xf32>
    %198 = arith.subf %194, %197 : vector<9x9xf32>
    %199 = math.exp %198 : vector<9x9xf32>
    %cst_99 = arith.constant dense<0.000000e+00> : vector<9xf32>
    %200 = vector.multi_reduction <add>, %199, %cst_99 [1] : vector<9x9xf32> to vector<9xf32>
    %201 = vector.shape_cast %200 : vector<9xf32> to vector<9x1xf32>
    %202 = tpu.reciprocal %201 {approx = true} : vector<9x1xf32> -> vector<9x1xf32>
    %203 = vector.broadcast %202 : vector<9x1xf32> to vector<9x9xf32>
    %204 = arith.mulf %199, %203 : vector<9x9xf32>
    %cst_100 = arith.constant dense<0.000000e+00> : vector<9x32xf32>
    %205 = tpu.matmul %204, %191, %cst_100 {dimension_numbers = #tpu.dot_dimension_numbers<[1], [0], [0], [1], [0, 0, 1, 1], [], []>} : vector<9x9xf32>, vector<9x32xf32>, vector<9x32xf32> -> vector<9x32xf32>
    %206 = tpu.concatenate %188, %205 in 1 : vector<9x32xf32>, vector<9x32xf32> -> vector<9x64xf32>
    %c0_101 = arith.constant 0 : index
    %c0_102 = arith.constant 0 : index
    %207 = vector.load %arg20[%c0_101, %c0_102] : memref<18x64xf32, #tpu.memory_space<vmem>>, vector<9x64xf32>
    tpu.vector_store %arg20[%c0_101, %c0_102], %206 {strides = array<i32>} : memref<18x64xf32, #tpu.memory_space<vmem>>, vector<9x64xf32>,
    %208 = vector.extract_strided_slice %171 {offsets = [9, 0], sizes = [9, 32], strides = [1, 1]} : vector<18x192xf32> to vector<9x32xf32>
    %209 = vector.extract_strided_slice %171 {offsets = [9, 64], sizes = [9, 32], strides = [1, 1]} : vector<18x192xf32> to vector<9x32xf32>
    %210 = vector.extract_strided_slice %171 {offsets = [9, 128], sizes = [9, 32], strides = [1, 1]} : vector<18x192xf32> to vector<9x32xf32>
    %cst_103 = arith.constant dense<0.000000e+00> : vector<9x9xf32>
    %211 = tpu.matmul %208, %209, %cst_103 {dimension_numbers = #tpu.dot_dimension_numbers<[1], [1], [0], [0], [0, 0, 1, 0], [], []>} : vector<9x32xf32>, vector<9x32xf32>, vector<9x9xf32> -> vector<9x9xf32>
    %cst_104 = arith.constant 0.176776692 : f32
    %212 = vector.broadcast %cst_104 : f32 to vector<9x9xf32>
    %213 = arith.mulf %211, %212 : vector<9x9xf32>
    %cst_105 = arith.constant dense<0xFF800000> : vector<9xf32>
    %214 = vector.multi_reduction <maximumf>, %213, %cst_105 [1] : vector<9x9xf32> to vector<9xf32>
    %215 = vector.shape_cast %214 : vector<9xf32> to vector<9x1xf32>
    %216 = vector.broadcast %215 : vector<9x1xf32> to vector<9x9xf32>
    %217 = arith.subf %213, %216 : vector<9x9xf32>
    %218 = math.exp %217 : vector<9x9xf32>
    %cst_106 = arith.constant dense<0.000000e+00> : vector<9xf32>
    %219 = vector.multi_reduction <add>, %218, %cst_106 [1] : vector<9x9xf32> to vector<9xf32>
    %220 = vector.shape_cast %219 : vector<9xf32> to vector<9x1xf32>
    %221 = tpu.reciprocal %220 {approx = true} : vector<9x1xf32> -> vector<9x1xf32>
    %222 = vector.broadcast %221 : vector<9x1xf32> to vector<9x9xf32>
    %223 = arith.mulf %218, %222 : vector<9x9xf32>
    %cst_107 = arith.constant dense<0.000000e+00> : vector<9x32xf32>
    %224 = tpu.matmul %223, %210, %cst_107 {dimension_numbers = #tpu.dot_dimension_numbers<[1], [0], [0], [1], [0, 0, 1, 1], [], []>} : vector<9x9xf32>, vector<9x32xf32>, vector<9x32xf32> -> vector<9x32xf32>
    %225 = vector.extract_strided_slice %171 {offsets = [9, 32], sizes = [9, 32], strides = [1, 1]} : vector<18x192xf32> to vector<9x32xf32>
    %226 = vector.extract_strided_slice %171 {offsets = [9, 96], sizes = [9, 32], strides = [1, 1]} : vector<18x192xf32> to vector<9x32xf32>
    %227 = vector.extract_strided_slice %171 {offsets = [9, 160], sizes = [9, 32], strides = [1, 1]} : vector<18x192xf32> to vector<9x32xf32>
    %cst_108 = arith.constant dense<0.000000e+00> : vector<9x9xf32>
    %228 = tpu.matmul %225, %226, %cst_108 {dimension_numbers = #tpu.dot_dimension_numbers<[1], [1], [0], [0], [0, 0, 1, 0], [], []>} : vector<9x32xf32>, vector<9x32xf32>, vector<9x9xf32> -> vector<9x9xf32>
    %cst_109 = arith.constant 0.176776692 : f32
    %229 = vector.broadcast %cst_109 : f32 to vector<9x9xf32>
    %230 = arith.mulf %228, %229 : vector<9x9xf32>
    %cst_110 = arith.constant dense<0xFF800000> : vector<9xf32>
    %231 = vector.multi_reduction <maximumf>, %230, %cst_110 [1] : vector<9x9xf32> to vector<9xf32>
    %232 = vector.shape_cast %231 : vector<9xf32> to vector<9x1xf32>
    %233 = vector.broadcast %232 : vector<9x1xf32> to vector<9x9xf32>
    %234 = arith.subf %230, %233 : vector<9x9xf32>
    %235 = math.exp %234 : vector<9x9xf32>
    %cst_111 = arith.constant dense<0.000000e+00> : vector<9xf32>
    %236 = vector.multi_reduction <add>, %235, %cst_111 [1] : vector<9x9xf32> to vector<9xf32>
    %237 = vector.shape_cast %236 : vector<9xf32> to vector<9x1xf32>
    %238 = tpu.reciprocal %237 {approx = true} : vector<9x1xf32> -> vector<9x1xf32>
    %239 = vector.broadcast %238 : vector<9x1xf32> to vector<9x9xf32>
    %240 = arith.mulf %235, %239 : vector<9x9xf32>
    %cst_112 = arith.constant dense<0.000000e+00> : vector<9x32xf32>
    %241 = tpu.matmul %240, %227, %cst_112 {dimension_numbers = #tpu.dot_dimension_numbers<[1], [0], [0], [1], [0, 0, 1, 1], [], []>} : vector<9x9xf32>, vector<9x32xf32>, vector<9x32xf32> -> vector<9x32xf32>
    %242 = tpu.concatenate %224, %241 in 1 : vector<9x32xf32>, vector<9x32xf32> -> vector<9x64xf32>
    %c9_113 = arith.constant 9 : index
    %c0_114 = arith.constant 0 : index
    %243 = vector.load %arg20[%c9_113, %c0_114] : memref<18x64xf32, #tpu.memory_space<vmem>>, vector<9x64xf32>
    tpu.vector_store %arg20[%c9_113, %c0_114], %242 {strides = array<i32>} : memref<18x64xf32, #tpu.memory_space<vmem>>, vector<9x64xf32>,
    %c0_115 = arith.constant 0 : index
    %c0_116 = arith.constant 0 : index
    %244 = vector.load %arg20[%c0_115, %c0_116] : memref<18x64xf32, #tpu.memory_space<vmem>>, vector<18x64xf32>
    %c1_117 = arith.constant 1 : index
    %c0_118 = arith.constant 0 : index
    %c0_119 = arith.constant 0 : index
    %245 = vector.load %arg6[%c1_117, %c0_118, %c0_119] : memref<2x64x32xf32, #tpu.memory_space<vmem>>, vector<1x64x32xf32>
    %246 = vector.shape_cast %245 : vector<1x64x32xf32> to vector<64x32xf32>
    %cst_120 = arith.constant dense<0.000000e+00> : vector<18x32xf32>
    %247 = tpu.matmul %244, %246, %cst_120 {dimension_numbers = #tpu.dot_dimension_numbers<[1], [0], [0], [1], [0, 0, 1, 1], [], []>} : vector<18x64xf32>, vector<64x32xf32>, vector<18x32xf32> -> vector<18x32xf32>
    %c1_121 = arith.constant 1 : index
    %c0_122 = arith.constant 0 : index
    %c0_123 = arith.constant 0 : index
    %248 = vector.load %arg7[%c1_121, %c0_122, %c0_123] : memref<2x1x32xf32, #tpu.memory_space<vmem>>, vector<1x1x32xf32>
    %249 = vector.shape_cast %248 : vector<1x1x32xf32> to vector<1x32xf32>
    %250 = vector.broadcast %249 : vector<1x32xf32> to vector<18x32xf32>
    %251 = arith.addf %247, %250 : vector<18x32xf32>
    %252 = arith.addf %251, %168 : vector<18x32xf32>
    %cst_124 = arith.constant dense<0.000000e+00> : vector<18xf32>
    %253 = vector.multi_reduction <add>, %252, %cst_124 [1] : vector<18x32xf32> to vector<18xf32>
    %254 = vector.shape_cast %253 : vector<18xf32> to vector<18x1xf32>
    %cst_125 = arith.constant 3.200000e+01 : f32
    %255 = vector.broadcast %cst_125 : f32 to vector<18x1xf32>
    %256 = arith.divf %254, %255 : vector<18x1xf32>
    %257 = vector.broadcast %256 : vector<18x1xf32> to vector<18x32xf32>
    %258 = arith.subf %252, %257 : vector<18x32xf32>
    %259 = arith.mulf %258, %258 : vector<18x32xf32>
    %cst_126 = arith.constant dense<0.000000e+00> : vector<18xf32>
    %260 = vector.multi_reduction <add>, %259, %cst_126 [1] : vector<18x32xf32> to vector<18xf32>
    %261 = vector.shape_cast %260 : vector<18xf32> to vector<18x1xf32>
    %cst_127 = arith.constant 3.200000e+01 : f32
    %262 = vector.broadcast %cst_127 : f32 to vector<18x1xf32>
    %263 = arith.divf %261, %262 : vector<18x1xf32>
    %264 = vector.broadcast %256 : vector<18x1xf32> to vector<18x32xf32>
    %265 = arith.subf %252, %264 : vector<18x32xf32>
    %cst_128 = arith.constant 9.99999974E-6 : f32
    %266 = vector.broadcast %cst_128 : f32 to vector<18x1xf32>
    %267 = arith.addf %263, %266 : vector<18x1xf32>
    %268 = math.rsqrt %267 : vector<18x1xf32>
    %269 = vector.broadcast %268 : vector<18x1xf32> to vector<18x32xf32>
    %270 = arith.mulf %265, %269 : vector<18x32xf32>
    %c1_129 = arith.constant 1 : index
    %c0_130 = arith.constant 0 : index
    %c0_131 = arith.constant 0 : index
    %271 = vector.load %arg8[%c1_129, %c0_130, %c0_131] : memref<2x1x32xf32, #tpu.memory_space<vmem>>, vector<1x1x32xf32>
    %272 = vector.shape_cast %271 : vector<1x1x32xf32> to vector<1x32xf32>
    %273 = vector.broadcast %272 : vector<1x32xf32> to vector<18x32xf32>
    %274 = arith.mulf %270, %273 : vector<18x32xf32>
    %c1_132 = arith.constant 1 : index
    %c0_133 = arith.constant 0 : index
    %c0_134 = arith.constant 0 : index
    %275 = vector.load %arg9[%c1_132, %c0_133, %c0_134] : memref<2x1x32xf32, #tpu.memory_space<vmem>>, vector<1x1x32xf32>
    %276 = vector.shape_cast %275 : vector<1x1x32xf32> to vector<1x32xf32>
    %277 = vector.broadcast %276 : vector<1x32xf32> to vector<18x32xf32>
    %278 = arith.addf %274, %277 : vector<18x32xf32>
    %c1_135 = arith.constant 1 : index
    %c0_136 = arith.constant 0 : index
    %c0_137 = arith.constant 0 : index
    %279 = vector.load %arg10[%c1_135, %c0_136, %c0_137] : memref<2x32x128xf32, #tpu.memory_space<vmem>>, vector<1x32x128xf32>
    %280 = vector.shape_cast %279 : vector<1x32x128xf32> to vector<32x128xf32>
    %cst_138 = arith.constant dense<0.000000e+00> : vector<18x128xf32>
    %281 = tpu.matmul %278, %280, %cst_138 {dimension_numbers = #tpu.dot_dimension_numbers<[1], [0], [0], [1], [0, 0, 1, 1], [], []>} : vector<18x32xf32>, vector<32x128xf32>, vector<18x128xf32> -> vector<18x128xf32>
    %c1_139 = arith.constant 1 : index
    %c0_140 = arith.constant 0 : index
    %c0_141 = arith.constant 0 : index
    %282 = vector.load %arg11[%c1_139, %c0_140, %c0_141] : memref<2x1x128xf32, #tpu.memory_space<vmem>>, vector<1x1x128xf32>
    %283 = vector.shape_cast %282 : vector<1x1x128xf32> to vector<1x128xf32>
    %284 = vector.broadcast %283 : vector<1x128xf32> to vector<18x128xf32>
    %285 = arith.addf %281, %284 : vector<18x128xf32>
    %cst_142 = arith.constant 0.000000e+00 : f32
    %286 = vector.broadcast %cst_142 : f32 to vector<18x128xf32>
    %287 = arith.maximumf %285, %286 : vector<18x128xf32>
    %c1_143 = arith.constant 1 : index
    %c0_144 = arith.constant 0 : index
    %c0_145 = arith.constant 0 : index
    %288 = vector.load %arg12[%c1_143, %c0_144, %c0_145] : memref<2x128x32xf32, #tpu.memory_space<vmem>>, vector<1x128x32xf32>
    %289 = vector.shape_cast %288 : vector<1x128x32xf32> to vector<128x32xf32>
    %cst_146 = arith.constant dense<0.000000e+00> : vector<18x32xf32>
    %290 = tpu.matmul %287, %289, %cst_146 {dimension_numbers = #tpu.dot_dimension_numbers<[1], [0], [0], [1], [0, 0, 1, 1], [], []>} : vector<18x128xf32>, vector<128x32xf32>, vector<18x32xf32> -> vector<18x32xf32>
    %c1_147 = arith.constant 1 : index
    %c0_148 = arith.constant 0 : index
    %c0_149 = arith.constant 0 : index
    %291 = vector.load %arg13[%c1_147, %c0_148, %c0_149] : memref<2x1x32xf32, #tpu.memory_space<vmem>>, vector<1x1x32xf32>
    %292 = vector.shape_cast %291 : vector<1x1x32xf32> to vector<1x32xf32>
    %293 = vector.broadcast %292 : vector<1x32xf32> to vector<18x32xf32>
    %294 = arith.addf %290, %293 : vector<18x32xf32>
    %295 = arith.addf %294, %278 : vector<18x32xf32>
    %cst_150 = arith.constant dense<0.000000e+00> : vector<18xf32>
    %296 = vector.multi_reduction <add>, %295, %cst_150 [1] : vector<18x32xf32> to vector<18xf32>
    %297 = vector.shape_cast %296 : vector<18xf32> to vector<18x1xf32>
    %cst_151 = arith.constant 3.200000e+01 : f32
    %298 = vector.broadcast %cst_151 : f32 to vector<18x1xf32>
    %299 = arith.divf %297, %298 : vector<18x1xf32>
    %300 = vector.broadcast %299 : vector<18x1xf32> to vector<18x32xf32>
    %301 = arith.subf %295, %300 : vector<18x32xf32>
    %302 = arith.mulf %301, %301 : vector<18x32xf32>
    %cst_152 = arith.constant dense<0.000000e+00> : vector<18xf32>
    %303 = vector.multi_reduction <add>, %302, %cst_152 [1] : vector<18x32xf32> to vector<18xf32>
    %304 = vector.shape_cast %303 : vector<18xf32> to vector<18x1xf32>
    %cst_153 = arith.constant 3.200000e+01 : f32
    %305 = vector.broadcast %cst_153 : f32 to vector<18x1xf32>
    %306 = arith.divf %304, %305 : vector<18x1xf32>
    %307 = vector.broadcast %299 : vector<18x1xf32> to vector<18x32xf32>
    %308 = arith.subf %295, %307 : vector<18x32xf32>
    %cst_154 = arith.constant 9.99999974E-6 : f32
    %309 = vector.broadcast %cst_154 : f32 to vector<18x1xf32>
    %310 = arith.addf %306, %309 : vector<18x1xf32>
    %311 = math.rsqrt %310 : vector<18x1xf32>
    %312 = vector.broadcast %311 : vector<18x1xf32> to vector<18x32xf32>
    %313 = arith.mulf %308, %312 : vector<18x32xf32>
    %c1_155 = arith.constant 1 : index
    %c0_156 = arith.constant 0 : index
    %c0_157 = arith.constant 0 : index
    %314 = vector.load %arg14[%c1_155, %c0_156, %c0_157] : memref<2x1x32xf32, #tpu.memory_space<vmem>>, vector<1x1x32xf32>
    %315 = vector.shape_cast %314 : vector<1x1x32xf32> to vector<1x32xf32>
    %316 = vector.broadcast %315 : vector<1x32xf32> to vector<18x32xf32>
    %317 = arith.mulf %313, %316 : vector<18x32xf32>
    %c1_158 = arith.constant 1 : index
    %c0_159 = arith.constant 0 : index
    %c0_160 = arith.constant 0 : index
    %318 = vector.load %arg15[%c1_158, %c0_159, %c0_160] : memref<2x1x32xf32, #tpu.memory_space<vmem>>, vector<1x1x32xf32>
    %319 = vector.shape_cast %318 : vector<1x1x32xf32> to vector<1x32xf32>
    %320 = vector.broadcast %319 : vector<1x32xf32> to vector<18x32xf32>
    %321 = arith.addf %317, %320 : vector<18x32xf32>
    %c0_161 = arith.constant 0 : index
    %c0_162 = arith.constant 0 : index
    %322 = vector.load %arg16[%c0_161, %c0_162] : memref<32x128xf32, #tpu.memory_space<vmem>>, vector<32x128xf32>
    %cst_163 = arith.constant dense<0.000000e+00> : vector<18x128xf32>
    %323 = tpu.matmul %321, %322, %cst_163 {dimension_numbers = #tpu.dot_dimension_numbers<[1], [0], [0], [1], [0, 0, 1, 1], [], []>} : vector<18x32xf32>, vector<32x128xf32>, vector<18x128xf32> -> vector<18x128xf32>
    %c0_164 = arith.constant 0 : index
    %c0_165 = arith.constant 0 : index
    %324 = vector.load %arg17[%c0_164, %c0_165] : memref<1x128xf32, #tpu.memory_space<vmem>>, vector<1x128xf32>
    %325 = vector.broadcast %324 : vector<1x128xf32> to vector<18x128xf32>
    %326 = arith.addf %323, %325 : vector<18x128xf32>
    %c0_166 = arith.constant 0 : index
    %c0_167 = arith.constant 0 : index
    %327 = vector.load %arg18[%c0_166, %c0_167] : memref<18x128xf32, #tpu.memory_space<vmem>>, vector<18x128xf32>
    tpu.vector_store %arg18[%c0_166, %c0_167], %326 {strides = array<i32>} : memref<18x128xf32, #tpu.memory_space<vmem>>, vector<18x128xf32>,
    return
  }
  func.func @transform_0(%arg0: i32) -> (i32, i32) {
    %c0_i32 = arith.constant 0 : i32
    %c0_i32_0 = arith.constant 0 : i32
    %c0_i32_1 = arith.constant 0 : i32
    return %c0_i32, %c0_i32_0 : i32, i32
  }
  func.func @transform_1(%arg0: i32) -> (i32, i32) {
    %c0_i32 = arith.constant 0 : i32
    %c0_i32_0 = arith.constant 0 : i32
    %c0_i32_1 = arith.constant 0 : i32
    return %c0_i32, %c0_i32_0 : i32, i32
  }
  func.func @transform_2(%arg0: i32) -> (i32, i32) {
    %c0_i32 = arith.constant 0 : i32
    %c0_i32_0 = arith.constant 0 : i32
    %c0_i32_1 = arith.constant 0 : i32
    return %c0_i32, %c0_i32_0 : i32, i32
  }
  func.func @transform_3(%arg0: i32) -> (i32, i32) {
    %c0_i32 = arith.constant 0 : i32
    %c0_i32_0 = arith.constant 0 : i32
    %c0_i32_1 = arith.constant 0 : i32
    return %c0_i32, %c0_i32_0 : i32, i32
  }
  func.func @transform_4(%arg0: i32) -> (i32, i32, i32) {
    %c0_i32 = arith.constant 0 : i32
    %c0_i32_0 = arith.constant 0 : i32
    %c0_i32_1 = arith.constant 0 : i32
    %c0_i32_2 = arith.constant 0 : i32
    return %c0_i32, %c0_i32_0, %c0_i32_1 : i32, i32, i32
  }
  func.func @transform_5(%arg0: i32) -> (i32, i32, i32) {
    %c0_i32 = arith.constant 0 : i32
    %c0_i32_0 = arith.constant 0 : i32
    %c0_i32_1 = arith.constant 0 : i32
    %c0_i32_2 = arith.constant 0 : i32
    return %c0_i32, %c0_i32_0, %c0_i32_1 : i32, i32, i32
  }
  func.func @transform_6(%arg0: i32) -> (i32, i32, i32) {
    %c0_i32 = arith.constant 0 : i32
    %c0_i32_0 = arith.constant 0 : i32
    %c0_i32_1 = arith.constant 0 : i32
    %c0_i32_2 = arith.constant 0 : i32
    return %c0_i32, %c0_i32_0, %c0_i32_1 : i32, i32, i32
  }
  func.func @transform_7(%arg0: i32) -> (i32, i32, i32) {
    %c0_i32 = arith.constant 0 : i32
    %c0_i32_0 = arith.constant 0 : i32
    %c0_i32_1 = arith.constant 0 : i32
    %c0_i32_2 = arith.constant 0 : i32
    return %c0_i32, %c0_i32_0, %c0_i32_1 : i32, i32, i32
  }
  func.func @transform_8(%arg0: i32) -> (i32, i32, i32) {
    %c0_i32 = arith.constant 0 : i32
    %c0_i32_0 = arith.constant 0 : i32
    %c0_i32_1 = arith.constant 0 : i32
    %c0_i32_2 = arith.constant 0 : i32
    return %c0_i32, %c0_i32_0, %c0_i32_1 : i32, i32, i32
  }
  func.func @transform_9(%arg0: i32) -> (i32, i32, i32) {
    %c0_i32 = arith.constant 0 : i32
    %c0_i32_0 = arith.constant 0 : i32
    %c0_i32_1 = arith.constant 0 : i32
    %c0_i32_2 = arith.constant 0 : i32
    return %c0_i32, %c0_i32_0, %c0_i32_1 : i32, i32, i32
  }
  func.func @transform_10(%arg0: i32) -> (i32, i32, i32) {
    %c0_i32 = arith.constant 0 : i32
    %c0_i32_0 = arith.constant 0 : i32
    %c0_i32_1 = arith.constant 0 : i32
    %c0_i32_2 = arith.constant 0 : i32
    return %c0_i32, %c0_i32_0, %c0_i32_1 : i32, i32, i32
  }
  func.func @transform_11(%arg0: i32) -> (i32, i32, i32) {
    %c0_i32 = arith.constant 0 : i32
    %c0_i32_0 = arith.constant 0 : i32
    %c0_i32_1 = arith.constant 0 : i32
    %c0_i32_2 = arith.constant 0 : i32
    return %c0_i32, %c0_i32_0, %c0_i32_1 : i32, i32, i32
  }
  func.func @transform_12(%arg0: i32) -> (i32, i32, i32) {
    %c0_i32 = arith.constant 0 : i32
    %c0_i32_0 = arith.constant 0 : i32
    %c0_i32_1 = arith.constant 0 : i32
    %c0_i32_2 = arith.constant 0 : i32
    return %c0_i32, %c0_i32_0, %c0_i32_1 : i32, i32, i32
  }
  func.func @transform_13(%arg0: i32) -> (i32, i32, i32) {
    %c0_i32 = arith.constant 0 : i32
    %c0_i32_0 = arith.constant 0 : i32
    %c0_i32_1 = arith.constant 0 : i32
    %c0_i32_2 = arith.constant 0 : i32
    return %c0_i32, %c0_i32_0, %c0_i32_1 : i32, i32, i32
  }
  func.func @transform_14(%arg0: i32) -> (i32, i32, i32) {
    %c0_i32 = arith.constant 0 : i32
    %c0_i32_0 = arith.constant 0 : i32
    %c0_i32_1 = arith.constant 0 : i32
    %c0_i32_2 = arith.constant 0 : i32
    return %c0_i32, %c0_i32_0, %c0_i32_1 : i32, i32, i32
  }
  func.func @transform_15(%arg0: i32) -> (i32, i32) {
    %c0_i32 = arith.constant 0 : i32
    %c0_i32_0 = arith.constant 0 : i32
    %c0_i32_1 = arith.constant 0 : i32
    return %c0_i32, %c0_i32_0 : i32, i32
  }
  func.func @transform_16(%arg0: i32) -> (i32, i32) {
    %c0_i32 = arith.constant 0 : i32
    %c0_i32_0 = arith.constant 0 : i32
    %c0_i32_1 = arith.constant 0 : i32
    return %c0_i32, %c0_i32_0 : i32, i32
  }
  func.func @transform_17(%arg0: i32) -> (i32, i32) {
    %c0_i32 = arith.constant 0 : i32
    %c0_i32_0 = arith.constant 0 : i32
    %c0_i32_1 = arith.constant 0 : i32
    return %c0_i32, %c0_i32_0 : i32, i32
  }
  func.func @transform_18(%arg0: i32) -> (i32, i32) {
    %c0_i32 = arith.constant 0 : i32
    %c0_i32_0 = arith.constant 0 : i32
    %c0_i32_1 = arith.constant 0 : i32
    return %c0_i32, %c0_i32_0 : i32, i32
  }
}

</mosaic_0001>

<bundles_post_ra>
// kernel: tpu_custom_call.1
= control target key start
LH: loop header
LB: loop body
LE: loop exit
PB: predicated region body
PF: predicated region fallthrough
CT: control target
= control target key end

     0   :  { %s4970_s0 = inlined_call_operand.vmem [shape: f32[16,11], index: 0, kind: input, shape index: {}]   ;;  %s4971_s1 = inlined_call_operand.vmem [shape: f32[2,32], index: 1, kind: input, shape index: {}]   ;;  %s4972_s2 = inlined_call_operand.vmem [shape: f32[11,32], index: 2, kind: input, shape index: {}]   ;;  %s4973_s3 = inlined_call_operand.vmem [shape: f32[1,32], index: 3, kind: input, shape index: {}]   ;;  %s4974_s4 = inlined_call_operand.vmem [shape: f32[2,32,192], index: 4, kind: input, shape index: {}]   ;;  %s4975_s5 = inlined_call_operand.vmem [shape: f32[2,64,32], index: 5, kind: input, shape index: {}]   ;;  %s4976_s6 = inlined_call_operand.vmem [shape: f32[2,1,32], index: 6, kind: input, shape index: {}]   ;;  %s4977_s7 = inlined_call_operand.vmem [shape: f32[2,1,32], index: 7, kind: input, shape index: {}]   ;;  %s4978_s8 = inlined_call_operand.vmem [shape: f32[2,1,32], index: 8, kind: input, shape index: {}]   ;;  %s4979_s9 = inlined_call_operand.vmem [shape: f32[2,32,128], index: 9, kind: input, shape index: {}]   ;;  %s4980_s10 = inlined_call_operand.vmem [shape: f32[2,1,128], index: 10, kind: input, shape index: {}]   ;;  %s4981_s11 = inlined_call_operand.vmem [shape: f32[2,128,32], index: 11, kind: input, shape index: {}]   ;;  %s4982_s12 = inlined_call_operand.vmem [shape: f32[2,1,32], index: 12, kind: input, shape index: {}]   ;;  %s4983_s13 = inlined_call_operand.vmem [shape: f32[2,1,32], index: 13, kind: input, shape index: {}]   ;;  %s4984_s14 = inlined_call_operand.vmem [shape: f32[2,1,32], index: 14, kind: input, shape index: {}]   ;;  %s4985_s15 = inlined_call_operand.vmem [shape: f32[32,128], index: 15, kind: input, shape index: {}]   ;;  %s4986_s16 = inlined_call_operand.vmem [shape: f32[1,128], index: 16, kind: input, shape index: {}]   ;;  %s4987_s17 = inlined_call_operand.hbm [shape: f32[18,128], index: 17, kind: output, shape index: {0}]   ;;  %s4988_s18 = inlined_call_operand.hbm [shape: f32[18,32], index: 18, kind: output, shape index: {1}]  }
   0x1   :  { %4991 = sst [smem:[#allocation9_spill]] %s4970_s0 }
   0x2   :  { %4992 = sst [smem:[#allocation10_spill]] %s4971_s1 }
   0x3   :  { %4993 = sst [smem:[#allocation11_spill]] %s4972_s2 }
   0x4   :  { %24 = vsyncpa [#allocation4], 0  ;;  %s4994_s29 = sld [smem:[#allocation11_spill]]  ;;  %vm78_vm0 = vcmask 1042432   ;;  %vm4067_vm1 = vmmov 1   ;;  %s4995_s20 = sld [smem:[#allocation9_spill]] }
   0x5   :  { %vm3649_vm2 = vmpackc.low %vm78_vm0, %vm4067_vm1  ;;  %vm71_vm3 = vcmask 89088  }
   0xa   :  { %v62_v0 = vld [vmem:[%s4994_s29] sm:$0xff]  ;;  %v63_v1 = vld [vmem:[%s4994_s29 + $0x8] sm:$0x7] }
   0xb   :  { %v3648_v2 = vpack.c.bf16 %v63_v1, %v62_v0  ;;  %v60_v3 = vld [vmem:[%s4995_s20] sm:$0xff] }
   0xc   :  { %3350 = vmatprep.mubr.msk.f32.mxu0 %vm71_vm3, %v60_v3 }
   0xd   :  { %3650 = vmatprep.subr.msk.bf16.mxu0 %vm3649_vm2, %v3648_v2 }
   0xe   :  { %25 = vsyncpa [#allocation6], 0  ;;  %3653 = vmatpush3.bf16.msk.msra.mxu0 %vm3649_vm2, %v3648_v2  ;;  %v61_v4 = vld [vmem:[%s4995_s20 + $0x8] sm:$0xff]  ;;  %v171_v6 = vld [vmem:[%s4974_s4 + $0x18] sm:$0xff]  ;;  %s4996_s19 = sld [smem:[#allocation10_spill]]  ;;  %vm160_vm4 = vcmask 253952  }
   0xf   :  { %v169_v5 = vld [vmem:[%s4974_s4 + $0x8] sm:$0xff]  ;;  %v168_v8 = vld [vmem:[%s4974_s4] sm:$0xff]  ;;  %v170_v9 = vld [vmem:[%s4974_s4 + $0x10] sm:$0xff]  ;;  %vm163_vm5 = vcmask 254977   ;;  %v4068_v17 = vmov 0.0   ;;  %vm158_vm6 = vcmask 261120  }
  0x10   :  { %v3654_v7 = vpack.c.bf16 %v171_v6, %v169_v5  ;;  %v3656_v10 = vpack.c.bf16 %v170_v9, %v168_v8  ;;  %v173_v12 = vld [vmem:[%s4974_s4 + $0x28] sm:$0xff]  ;;  %v175_v13 = vld [vmem:[%s4974_s4 + $0x38] sm:$0xff]  ;;  %v172_v14 = vld [vmem:[%s4974_s4 + $0x20] sm:$0xff]  ;;  %255 = vmatprep.mubr.f32.mxu1 %v4068_v17  ;;  %s4070_s28 = smov 64   ;;  %vm687_vm7 = vcmask 1046528   ;;  %s4071_s29 = smov 32  }
  0x11   :  { %3351 = vmatmul.mubr.msk.f32.vlgmr.msra.gmra.mrb[0].mxu0 %vm71_vm3, %v61_v4  ;;  %v3658_v15 = vpack.c.bf16 %v175_v13, %v173_v12  ;;  %v174_v16 = vld [vmem:[%s4974_s4 + $0x30] sm:$0xff]  ;;  %v3058_v19 = vld [vmem:[%s4973_s3] ss:$0 sm:$0xff]  ;;  %s4069_s3 = smov 96   ;;  %vm389_vm8 = vcmask 1040384   ;;  %vm4266_vm9 = vmpackc.low %vm158_vm6, %vm158_vm6  ;;  %vm363_vm11 = vcmask 65536  }
  0x12   :  { %3856 = vmatprep.subr.bf16.mxu1 %v3654_v7  ;;  %3655 = vmatprep.subr.bf16.mxu0 %v3654_v7  ;;  %v3660_v18 = vpack.c.bf16 %v174_v16, %v172_v14  ;;  %vm4271_vm10 = vmpackc.low %vm389_vm8, %vm4067_vm1  ;;  %vm359_vm12 = vcmask 72704   ;;  %vm4073_vm13 = vmmov 0   ;;  %vm682_vm14 = vcmask 523264  }
  0x13   :  { %3858 = vmatpush1.bf16.msra.mxu1 %v3656_v10  ;;  %3657 = vmatpush1.bf16.msra.mxu0 %v3656_v10  ;;  %vm684_vm15 = vcmask 516096   ;;  %vm1221_vm0 = vcmask 254976  }
  0x14   :  { %v157_v11 = vld [vmem:[%s4996_s19] sm:$0x3]  ;;  %249 = vmatprep.mubr.f32.mxu0 %v4068_v17  ;;  %3857 = vmatprep.subr.bf16.mxu1 %v3658_v15  ;;  %s4074_s19 = smov [#allocation5]  }
  0x15   :  { %161 = vst.msk [vmem:[#allocation5 + $0x8] sm:$0x1] %vm160_vm4, %v157_v11  ;;  %3659 = vmatprep.subr.bf16.mxu0 %v3658_v15  ;;  %s3043_s1 = sshll.u32 %s4074_s19, 4  ;;  %s3044_s1 = int_to_ptr.vmem [resolvable:$true] %s3043_s1 }
  0x16   :  { %164 = vst.msk [vmem:[#allocation5 + $0x10] sm:$0x2] %vm163_vm5, %v157_v11  ;;  %p4024_p1 = scmp.lt.s32.totalorder %s3044_s1, %s3044_s1 }
  0x17   :  { %3859 = vmatpush1.bf16.msra.mxu1 %v3660_v18  ;;  %3661 = vmatpush1.bf16.msra.mxu0 %v3660_v18 }
  0xe4   :  { %v3352_v20 = vpop.f32.mrb[0].mxu0 }
  0xe5   :  { %v154_v21 = vadd.f32 %v3352_v20, %v3058_v19  ;;  %v148_v22 = vpop.f32.mrb[1].mxu0 }
  0xe6   :  { %v149_v23 = vadd.f32 %v3058_v19, %v148_v22 }
  0xe7   :  { %162 = vst.msk [vmem:[#allocation5 + $0x9] sm:$0xff] %vm158_vm6, %v154_v21 }
  0xe8   :  { %159 = vst.msk [vmem:[#allocation5] sm:$0xff] %vm158_vm6, %v149_v23 }
  0xee   :  { %v4220_v24 = vld [vmem:[#allocation5 + $0x8] sm:$0xff]  ;;  %v4229_v26 = vld [vmem:[#allocation5 + $0x10] sm:$0x3] }
  0xef   :  { %3063 = vmatmul.mubr.msk.f32.vlgmr.msra.gmra.mrb[0].mxu1 %vm158_vm6, %v4220_v24  ;;  %v4224_v25 = vld [vmem:[#allocation5] sm:$0xff] }
  0xf0   :  { %3062 = vmatmul.mubr.msk.f32.vlgmr.msra.gmra.mrb[2].mxu0 %vm158_vm6, %v4224_v25  ;;  %261 = vmatprep.mubr.f32.mxu1 %v4068_v17 }
  0xf3   :  { %3064 = vmatmul.mubr.msk.f32.gmra.mrb[2].mxu1 %vm158_vm6, %v4229_v26 }
 0x1c2   :  { %v4233_v27 = vpop.f32.mrb[0].mxu1 }
 0x1c3   :  { %v251_v28 = vpop.f32.mrb[2].mxu0  ;;  %v4235_v29 = vpop.f32.mrb[1].mxu1  ;;  %v688_v23 = vrot.slane %v4233_v27, 1 }
 0x1c4   :  { %468 = vrot.lane.b32.xlu1 %v251_v28, %s4069_s3  ;;  %v4238_v30 = vpop.f32.mrb[3].mxu0  ;;  %3357 = vmatprep.mubr.msk.f32.mxu0 %vm158_vm6, %v251_v28  ;;  %v3871_v31 = vpack.i.bf16 %v4233_v27, %v251_v28  ;;  %v803_v36 = vrot.slane %v4235_v29, 1 }
 0x1c5   :  { %v3881_v32 = vpack.i.bf16 %v4235_v29, %v4238_v30  ;;  %v3668_v33 = vpack.c.bf16 %v4235_v29, %v4238_v30 }
 0x1c6   :  { %v4246_v34 = vpop.f32.mrb[2].mxu1  ;;  %3872 = vrot.lane.b32.xlu0 %v3871_v31, %s4070_s28 }
 0x1c7   :  { %v265_v35 = vpop.f32.mrb[3].mxu1  ;;  %v4303_v22 = vrot.slane %v4246_v34, 1 }
 0x1c8   :  { %v4250_v37 = vrot.slane %v265_v35, 1  ;;  %470 = vrot.lane.b32.xlu1 %v4233_v27, %s4069_s3 }
 0x1c9   :  { %v4312_v28 = vsel %vm687_vm7, %v688_v23, %v4303_v22 }
 0x1ca   :  { %v4256_v38 = vsel %vm687_vm7, %v803_v36, %v4250_v37  ;;  %3877 = vrot.lane.b32.xlu0 %v3871_v31, %s4071_s29  ;;  %v3886_v31 = vpack.i.bf16 %v4303_v22, %v4312_v28 }
 0x1cb   :  { %v3692_v39 = vpack.c.bf16 %v4250_v37, %v4256_v38  ;;  %v3896_v40 = vpack.i.bf16 %v4250_v37, %v4256_v38 }
 0x236   :  { %v469_v41 = vpop.permute.xlu1 %468 }
 0x237   :  { %3371 = vmatprep.mubr.msk.f32.mxu1 %vm158_vm6, %v469_v41 }
 0x238   :  { %v3873_v42 = vpop.permute.xlu0 %3872 }
 0x239   :  { %v3875_v43 = vunpack.i.h.bf16 %v3873_v42  ;;  %v3874_v44 = vunpack.i.l.bf16 %v3873_v42 }
 0x23a   :  { %v471_v52 = vpop.permute.xlu1 %470 }
 0x23b   :  { %v3662_v46 = vpack.c.bf16 %v3875_v43, %v3874_v44 }
 0x23c   :  { %v3878_v48 = vpop.permute.xlu0 %3877 }
 0x23d   :  { %v3880_v49 = vunpack.i.h.bf16 %v3878_v48  ;;  %v3879_v50 = vunpack.i.l.bf16 %v3878_v48  ;;  %3664 = vmatprep.subr.msk.bf16.mxu0 %vm4266_vm9, %v3662_v46 }
 0x23e   :  { %3667 = vmatpush3.bf16.xpose.msk.msra.mxu0 %vm4266_vm9, %v3662_v46 }
 0x23f   :  { %v3674_v51 = vpack.c.bf16 %v3880_v49, %v3879_v50  ;;  %3670 = vmatprep.subr.msk.bf16.mxu0 %vm4271_vm10, %v3668_v33 }
 0x241   :  { %3676 = vmatprep.subr.msk.bf16.mxu1 %vm4266_vm9, %v3674_v51 }
 0x242   :  { %3679 = vmatpush3.bf16.xpose.msk.msra.mxu1 %vm4266_vm9, %v3674_v51 }
 0x243   :  { %3694 = vmatprep.subr.msk.bf16.mxu1 %vm4271_vm10, %v3692_v39 }
 0x245   :  { %3358 = vmatmul.mubr.msk.f32.vlgmr.msra.gmra.mrb[4].mxu0 %vm158_vm6, %v4233_v27 }
 0x246   :  { %3673 = vmatpush3.bf16.msk.msra.mxu0 %vm4271_vm10, %v3668_v33 }
 0x249   :  { %3372 = vmatmul.mubr.msk.f32.vlgmr.msra.gmra.mrb[4].mxu1 %vm158_vm6, %v471_v52 }
 0x24a   :  { %3697 = vmatpush3.bf16.msk.msra.mxu1 %vm4271_vm10, %v3692_v39 }
 0x318   :  { %v3359_v53 = vpop.f32.mrb[4].mxu0 }
 0x319   :  { %v358_v54 = vmul.f32 0.17677669, %v3359_v53  ;;  %v348_v55 = vpop.f32.mrb[5].mxu0 }
 0x31a   :  { %v357_v56 = vmul.f32 0.17677669, %v348_v55 }
 0x31b   :  { %v364_v57 = vsel %vm363_vm11, %v358_v54, -inf }
 0x31c   :  { %v3373_v58 = vpop.f32.mrb[4].mxu1  ;;  %365 = vmax.xlane.f32.xlu1 %v364_v57  ;;  %v360_v59 = vsel %vm359_vm12, %v357_v56, -inf }
 0x31d   :  { %v550_v60 = vpop.f32.mrb[5].mxu1  ;;  %361 = vmax.xlane.f32.xlu0 %v360_v59  ;;  %v560_v62 = vmul.f32 0.17677669, %v3373_v58 }
 0x31e   :  { %v559_v61 = vmul.f32 0.17677669, %v550_v60 }
 0x31f   :  { %v564_v0 = vsel %vm363_vm11, %v560_v62, -inf }
 0x320   :  { %v561_v63 = vsel %vm359_vm12, %v559_v61, -inf }
 0x321   :  { %562 = vmax.xlane.f32.xlu0 %v561_v63 }
 0x325   :  { %565 = vmax.xlane.f32.xlu0 %v564_v0 }
 0x3a9   :  { %v366_v1 = vpop.xlane.xlu1 %365 }
 0x3aa   :  { %v368_v2 = vsub.f32 %v358_v54, %v366_v1  ;;  %v362_v3 = vpop.xlane.xlu0 %361 }
 0x3ab   :  { %v367_v4 = vsub.f32 %v357_v56, %v362_v3 }
 0x3ac   :  { %v371_v5 = vmul.f32 1.442695, %v368_v2 }
 0x3ad   :  { %v369_v6 = vmul.f32 1.442695, %v367_v4 }
 0x3ae   :  { %3931 = vpow2.f32 %v371_v5  ;;  %v563_v7 = vpop.xlane.xlu0 %562 }
 0x3af   :  { %3933 = vpow2.f32 %v369_v6  ;;  %v567_v8 = vsub.f32 %v559_v61, %v563_v7 }
 0x3b1   :  { %v569_v9 = vmul.f32 1.442695, %v567_v8 }
 0x3b2   :  { %v566_v10 = vpop.xlane.xlu0 %565 }
 0x3b3   :  { %3935 = vpow2.f32 %v569_v9  ;;  %v568_v11 = vsub.f32 %v560_v62, %v566_v10 }
 0x3b5   :  { %v571_v12 = vmul.f32 1.442695, %v568_v11 }
 0x3b7   :  { %3937 = vpow2.f32 %v571_v12 }
 0x3b8   :  { %v3932_v13 = vpop.eup %3931 }
 0x3b9   :  { %v3934_v14 = vpop.eup %3933  ;;  %v376_v15 = vsel %vm363_vm11, %v3932_v13, 0.0 }
 0x3ba   :  { %377 = vadd.xlane.f32.xlu0 %v376_v15  ;;  %v373_v16 = vsel %vm359_vm12, %v3934_v14, 0.0 }
 0x3bb   :  { %374 = vadd.xlane.f32.xlu1 %v373_v16 }
 0x3bd   :  { %v3936_v18 = vpop.eup %3935 }
 0x3be   :  { %v573_v19 = vsel %vm359_vm12, %v3936_v18, 0.0 }
 0x3bf   :  { %574 = vadd.xlane.f32.xlu1 %v573_v19 }
 0x3c1   :  { %v3938_v20 = vpop.eup %3937 }
 0x3c2   :  { %v576_v21 = vsel %vm363_vm11, %v3938_v20, 0.0 }
 0x3c3   :  { %577 = vadd.xlane.f32.xlu0 %v576_v21 }
 0x3d0   :  { %3882 = vrot.lane.b32.xlu1 %v3881_v32, %s4069_s3 }
 0x3d9   :  { %3887 = vrot.lane.b32.xlu0 %v3886_v31, %s4070_s28 }
 0x447   :  { %v378_v33 = vpop.xlane.xlu0 %377 }
 0x448   :  { %3939 = vrcp.f32 %v378_v33  ;;  %v375_v34 = vpop.xlane.xlu1 %374 }
 0x449   :  { %3941 = vrcp.f32 %v375_v34 }
 0x44c   :  { %v575_v35 = vpop.xlane.xlu1 %574 }
 0x44d   :  { %3943 = vrcp.f32 %v575_v35 }
 0x450   :  { %v3883_v36 = vpop.permute.xlu1 %3882  ;;  %v578_v29 = vpop.xlane.xlu0 %577 }
 0x451   :  { %v3885_v30 = vunpack.i.h.bf16 %v3883_v36  ;;  %v3884_v32 = vunpack.i.l.bf16 %v3883_v36  ;;  %3945 = vrcp.f32 %v578_v29 }
 0x452   :  { %v3940_v27 = vpop.eup %3939 }
 0x453   :  { %v3942_v39 = vpop.eup %3941  ;;  %v3680_v41 = vpack.c.bf16 %v3885_v30, %v3884_v32  ;;  %v382_v44 = vmul.f32 %v3940_v27, %v3932_v13 }
 0x454   :  { %v3888_v42 = vpop.permute.xlu0 %3887  ;;  %v381_v43 = vmul.f32 %v3942_v39, %v3934_v14 }
 0x455   :  { %v3890_v46 = vunpack.i.h.bf16 %v3888_v42  ;;  %v3889_v48 = vunpack.i.l.bf16 %v3888_v42  ;;  %3682 = vmatprep.subr.msk.bf16.mxu0 %vm4271_vm10, %v3680_v41 }
 0x456   :  { %3364 = vmatprep.mubr.msk.f32.mxu0 %vm359_vm12, %v381_v43 }
 0x457   :  { %v3944_v49 = vpop.eup %3943  ;;  %v3686_v50 = vpack.c.bf16 %v3890_v46, %v3889_v48  ;;  %3365 = vmatmul.mubr.msk.f32.vlgmr.msra.gmra.mrb[6].mxu0 %vm359_vm12, %v382_v44 }
 0x458   :  { %3685 = vmatpush3.bf16.msk.msra.mxu0 %vm4271_vm10, %v3680_v41  ;;  %v581_v51 = vmul.f32 %v3944_v49, %v3936_v18  ;;  %v4072_v49 = vmov 0.0|0.0  }
 0x459   :  { %3688 = vmatprep.subr.msk.bf16.mxu0 %vm4266_vm9, %v3686_v50 }
 0x45a   :  { %3378 = vmatprep.mubr.msk.f32.mxu0 %vm359_vm12, %v581_v51 }
 0x45b   :  { %v3946_v52 = vpop.eup %3945 }
 0x45c   :  { %v582_v53 = vmul.f32 %v3946_v52, %v3938_v20 }
 0x45e   :  { %3379 = vmatmul.mubr.msk.f32.vlgmr.msra.gmra.mrb[8].mxu0 %vm359_vm12, %v582_v53 }
 0x45f   :  { %3385 = vmatprep.mubr.msk.f32.mxu0 %vm158_vm6, %v4312_v28 }
 0x461   :  { %3691 = vmatpush3.bf16.xpose.msk.msra.mxu0 %vm4266_vm9, %v3686_v50 }
 0x468   :  { %3386 = vmatmul.mubr.msk.f32.vlgmr.msra.gmra.mrb[10].mxu0 %vm158_vm6, %v4303_v22 }
 0x52a   :  { %v4333_v54 = vpop.f32.mrb[6].mxu0 }
 0x52b   :  { %v4335_v55 = vpop.f32.mrb[7].mxu0 }
 0x531   :  { %v4337_v56 = vpop.f32.mrb[8].mxu0 }
 0x532   :  { %v4339_v57 = vpop.f32.mrb[9].mxu0 }
 0x53b   :  { %v3387_v58 = vpop.f32.mrb[10].mxu0 }
 0x53c   :  { %v779_v59 = vmul.f32 0.17677669, %v3387_v58  ;;  %v769_v60 = vpop.f32.mrb[11].mxu0 }
 0x53d   :  { %v778_v61 = vmul.f32 0.17677669, %v769_v60 }
 0x53e   :  { %v783_v62 = vsel %vm363_vm11, %v779_v59, -inf }
 0x53f   :  { %784 = vmax.xlane.f32.xlu0 %v783_v62  ;;  %v780_v63 = vsel %vm359_vm12, %v778_v61, -inf }
 0x540   :  { %781 = vmax.xlane.f32.xlu1 %v780_v63 }
 0x551   :  { %3892 = vrot.lane.b32.xlu1 %v3886_v31, %s4071_s29 }
 0x5cc   :  { %v785_v0 = vpop.xlane.xlu0 %784 }
 0x5cd   :  { %v787_v1 = vsub.f32 %v779_v59, %v785_v0  ;;  %v782_v2 = vpop.xlane.xlu1 %781  ;;  %v1109_v59 = vld [vmem:[%s4975_s5 + $0x8] sm:$0xff]  ;;  %v1110_v0 = vld [vmem:[%s4975_s5 + $0x10] sm:$0xff] }
 0x5ce   :  { %v786_v3 = vsub.f32 %v778_v61, %v782_v2 }
 0x5cf   :  { %v790_v4 = vmul.f32 1.442695, %v787_v1  ;;  %v1111_v1 = vld [vmem:[%s4975_s5 + $0x18] sm:$0xff] }
 0x5d0   :  { %v788_v5 = vmul.f32 1.442695, %v786_v3  ;;  %v3714_v2 = vpack.c.bf16 %v1111_v1, %v1110_v0  ;;  %v1112_v3 = vld [vmem:[%s4975_s5 + $0x20] sm:$0xff] }
 0x5d1   :  { %3947 = vpow2.f32 %v790_v4  ;;  %v3893_v6 = vpop.permute.xlu1 %3892  ;;  %v1113_v4 = vld [vmem:[%s4975_s5 + $0x28] sm:$0xff] }
 0x5d2   :  { %3949 = vpow2.f32 %v788_v5  ;;  %v3895_v7 = vunpack.i.h.bf16 %v3893_v6  ;;  %v3894_v8 = vunpack.i.l.bf16 %v3893_v6  ;;  %v3717_v5 = vpack.c.bf16 %v1113_v4, %v1112_v3  ;;  %v1114_v6 = vld [vmem:[%s4975_s5 + $0x30] sm:$0xff] }
 0x5d4   :  { %v3698_v9 = vpack.c.bf16 %v3895_v7, %v3894_v8  ;;  %v1115_v7 = vld [vmem:[%s4975_s5 + $0x38] sm:$0xff] }
 0x5d5   :  { %v3720_v8 = vpack.c.bf16 %v1115_v7, %v1114_v6  ;;  %v1381_v7 = vld [vmem:[%s4981_s11 + $0x10] sm:$0xff] }
 0x5d6   :  { %3700 = vmatprep.subr.msk.bf16.mxu1 %vm4266_vm9, %v3698_v9 }
 0x5db   :  { %v3948_v10 = vpop.eup %3947 }
 0x5dc   :  { %v3950_v11 = vpop.eup %3949  ;;  %v795_v12 = vsel %vm363_vm11, %v3948_v10, 0.0 }
 0x5dd   :  { %796 = vadd.xlane.f32.xlu0 %v795_v12  ;;  %v792_v13 = vsel %vm359_vm12, %v3950_v11, 0.0 }
 0x5de   :  { %793 = vadd.xlane.f32.xlu1 %v792_v13 }
 0x5ef   :  { %892 = vrot.lane.b32.xlu1 %v4303_v22, %s4069_s3 }
 0x5f3   :  { %890 = vrot.lane.b32.xlu0 %v4312_v28, %s4069_s3 }
 0x66a   :  { %v797_v14 = vpop.xlane.xlu0 %796 }
 0x66b   :  { %3951 = vrcp.f32 %v797_v14  ;;  %v794_v15 = vpop.xlane.xlu1 %793  ;;  %v3093_v14 = vld [vmem:[%s4976_s6] ss:$0 sm:$0xff] }
 0x66c   :  { %3953 = vrcp.f32 %v794_v15 }
 0x66e   :  { %v891_v21 = vpop.permute.xlu0 %890 }
 0x66f   :  { %v893_v22 = vpop.permute.xlu1 %892 }
 0x675   :  { %v3952_v16 = vpop.eup %3951 }
 0x676   :  { %v3954_v18 = vpop.eup %3953  ;;  %v801_v20 = vmul.f32 %v3952_v16, %v3948_v10 }
 0x677   :  { %v800_v19 = vmul.f32 %v3954_v18, %v3950_v11 }
 0x679   :  { %3392 = vmatprep.mubr.msk.f32.mxu1 %vm359_vm12, %v800_v19 }
 0x67a   :  { %3393 = vmatmul.mubr.msk.f32.vlgmr.msra.gmra.mrb[6].mxu1 %vm359_vm12, %v801_v20 }
 0x67b   :  { %3703 = vmatpush3.bf16.xpose.msk.msra.mxu1 %vm4266_vm9, %v3698_v9  ;;  %3399 = vmatprep.mubr.msk.f32.mxu1 %vm158_vm6, %v891_v21 }
 0x67c   :  { %3722 = vmatprep.subr.bf16.mxu1 %v4072_v49 }
 0x682   :  { %3400 = vmatmul.mubr.msk.f32.vlgmr.msra.gmra.mrb[8].mxu1 %vm158_vm6, %v893_v22 }
 0x683   :  { %3442 = vmatprep.mubr.msk.f32.mxu1 %vm4073_vm13, %v4068_v17 }
 0x74d   :  { %v4358_v23 = vpop.f32.mrb[6].mxu1 }
 0x74e   :  { %v4360_v28 = vpop.f32.mrb[7].mxu1 }
 0x755   :  { %v3401_v31 = vpop.f32.mrb[8].mxu1 }
 0x756   :  { %v982_v33 = vmul.f32 0.17677669, %v3401_v31  ;;  %v972_v34 = vpop.f32.mrb[9].mxu1 }
 0x757   :  { %v981_v35 = vmul.f32 0.17677669, %v972_v34 }
 0x758   :  { %v986_v36 = vsel %vm363_vm11, %v982_v33, -inf }
 0x759   :  { %987 = vmax.xlane.f32.xlu0 %v986_v36  ;;  %v983_v29 = vsel %vm359_vm12, %v981_v35, -inf }
 0x75a   :  { %984 = vmax.xlane.f32.xlu1 %v983_v29  ;;  %v1277_v29 = vld [vmem:[%s4979_s9 + $0x8] sm:$0xff] }
 0x7e6   :  { %v988_v30 = vpop.xlane.xlu0 %987 }
 0x7e7   :  { %v990_v32 = vsub.f32 %v982_v33, %v988_v30  ;;  %v985_v27 = vpop.xlane.xlu1 %984 }
 0x7e8   :  { %v989_v39 = vsub.f32 %v981_v35, %v985_v27  ;;  %v1279_v27 = vld [vmem:[%s4979_s9 + $0x18] sm:$0xff] }
 0x7e9   :  { %v993_v41 = vmul.f32 1.442695, %v990_v32  ;;  %v1278_v32 = vld [vmem:[%s4979_s9 + $0x10] sm:$0xff] }
 0x7ea   :  { %v991_v42 = vmul.f32 1.442695, %v989_v39  ;;  %v3726_v39 = vpack.c.bf16 %v1279_v27, %v1278_v32 }
 0x7eb   :  { %3955 = vpow2.f32 %v993_v41 }
 0x7ec   :  { %3957 = vpow2.f32 %v991_v42 }
 0x7f5   :  { %v3956_v43 = vpop.eup %3955 }
 0x7f6   :  { %v3958_v44 = vpop.eup %3957  ;;  %v998_v46 = vsel %vm363_vm11, %v3956_v43, 0.0 }
 0x7f7   :  { %999 = vadd.xlane.f32.xlu1 %v998_v46  ;;  %v995_v48 = vsel %vm359_vm12, %v3958_v44, 0.0 }
 0x7f8   :  { %996 = vadd.xlane.f32.xlu0 %v995_v48 }
 0x808   :  { %674 = vrot.lane.b32.xlu1 %v4339_v57, %s4071_s29 }
 0x80c   :  { %676 = vrot.lane.b32.xlu1 %v4337_v56, %s4071_s29 }
 0x80e   :  { %3897 = vrot.lane.b32.xlu0 %v3896_v40, %s4069_s3 }
 0x884   :  { %v1000_v50 = vpop.xlane.xlu1 %999 }
 0x885   :  { %3959 = vrcp.f32 %v1000_v50  ;;  %v997_v51 = vpop.xlane.xlu0 %996 }
 0x886   :  { %3961 = vrcp.f32 %v997_v51  ;;  %v4458_v51 = vld [vmem:[%s4977_s7] ss:$0 sm:$0xff] }
 0x888   :  { %v675_v52 = vpop.permute.xlu1 %674 }
 0x889   :  { %v680_v53 = vsel %vm158_vm6, %v4335_v55, %v675_v52  ;;  %v3898_v56 = vpop.permute.xlu0 %3897  ;;  %v1108_v55 = vld [vmem:[%s4975_s5] sm:$0xff] }
 0x88a   :  { %683 = vst.msk [vmem:[#allocation2] sm:$0xff] %vm682_vm14, %v680_v53  ;;  %v3900_v37 = vunpack.i.h.bf16 %v3898_v56  ;;  %v3899_v38 = vunpack.i.l.bf16 %v3898_v56  ;;  %v3711_v62 = vpack.c.bf16 %v1109_v59, %v1108_v55  ;;  %v4464_v56 = vld [vmem:[%s4978_s8] ss:$0 sm:$0xff] }
 0x88c   :  { %v3704_v40 = vpack.c.bf16 %v3900_v37, %v3899_v38  ;;  %v677_v57 = vpop.permute.xlu1 %676 }
 0x88d   :  { %v681_v58 = vsel %vm158_vm6, %v4333_v54, %v677_v57 }
 0x88e   :  { %685 = vst.msk [vmem:[#allocation2 + $0x8] sm:$0x1] %vm684_vm15, %v681_v58  ;;  %3706 = vmatprep.subr.msk.bf16.mxu0 %vm4271_vm10, %v3704_v40 }
 0x88f   :  { %v3960_v60 = vpop.eup %3959  ;;  %3709 = vmatpush3.bf16.msk.msra.mxu0 %vm4271_vm10, %v3704_v40 }
 0x890   :  { %v3962_v61 = vpop.eup %3961  ;;  %3710 = vmatprep.subr.bf16.mxu0 %v4072_v49  ;;  %v1004_v63 = vmul.f32 %v3960_v60, %v3956_v43  ;;  %v1379_v60 = vld [vmem:[%s4981_s11] sm:$0xff] }
 0x891   :  { %v1003_v54 = vmul.f32 %v3962_v61, %v3958_v44  ;;  %v1105_v9 = vld [vmem:[#allocation2] sm:$0xff]  ;;  %v1380_v61 = vld [vmem:[%s4981_s11 + $0x8] sm:$0xff] }
 0x893   :  { %3406 = vmatprep.mubr.msk.f32.mxu0 %vm359_vm12, %v1003_v54  ;;  %v3729_v54 = vpack.c.bf16 %v1380_v61, %v1379_v60 }
 0x894   :  { %3407 = vmatmul.mubr.msk.f32.vlgmr.msra.gmra.mrb[12].mxu0 %vm359_vm12, %v1004_v63 }
 0x895   :  { %3712 = vmatpush3.bf16.msra.mxu0 %v3711_v62  ;;  %3425 = vmatprep.mubr.msk.f32.mxu0 %vm4073_vm13, %v4068_v17 }
 0x896   :  { %3713 = vmatprep.subr.bf16.mxu0 %v4072_v49 }
 0x899   :  { %3715 = vmatpush3.bf16.msra.mxu0 %v3714_v2 }
 0x89a   :  { %3716 = vmatprep.subr.bf16.mxu0 %v4072_v49 }
 0x89d   :  { %3718 = vmatpush3.bf16.msra.mxu0 %v3717_v5 }
 0x89e   :  { %3719 = vmatprep.subr.bf16.mxu0 %v4072_v49 }
 0x8a1   :  { %3721 = vmatpush3.bf16.msra.mxu0 %v3720_v8  ;;  %v1382_v8 = vld [vmem:[%s4981_s11 + $0x18] sm:$0xff] }
 0x8a4   :  { %3426 = vmatmul.mubr.msk.f32.vlgmr.msra.gmra.mrb[14].mxu0 %vm682_vm14, %v1105_v9  ;;  %v3732_v9 = vpack.c.bf16 %v1382_v8, %v1381_v7  ;;  %v3107_v7 = vld [vmem:[%s4974_s4 + $0x48] sm:$0xff]  ;;  %v3109_v8 = vld [vmem:[%s4974_s4 + $0x58] sm:$0xff] }
 0x8a5   :  { %3428 = vmatprep.mubr.msk.f32.mxu0 %vm4073_vm13, %v4068_v17 }
 0x967   :  { %v3408_v10 = vpop.f32.mrb[12].mxu0 }
 0x968   :  { %1097 = vrot.lane.b32.xlu1 %v3408_v10, %s4071_s29  ;;  %v1084_v11 = vpop.f32.mrb[13].mxu0  ;;  %v1383_v10 = vld [vmem:[%s4981_s11 + $0x20] sm:$0xff] }
 0x969   :  { %1095 = vrot.lane.b32.xlu0 %v1084_v11, %s4071_s29  ;;  %v1384_v11 = vld [vmem:[%s4981_s11 + $0x28] sm:$0xff] }
 0x977   :  { %v1198_v12 = vpop.f32.mrb[14].mxu0 }
 0x978   :  { %v3427_v13 = vpop.f32.mrb[15].mxu0  ;;  %v1199_v15 = vadd.f32 %v3093_v14, %v1198_v12  ;;  %v3735_v12 = vpack.c.bf16 %v1384_v11, %v1383_v10  ;;  %v3108_v10 = vld [vmem:[%s4974_s4 + $0x50] sm:$0xff] }
 0x979   :  { %v1385_v13 = vld [vmem:[%s4981_s11 + $0x30] sm:$0xff] }
 0x97a   :  { %v1212_v16 = vadd.f32 %v1199_v15, %v4224_v25  ;;  %v1387_v15 = vld [vmem:[%s4981_s11 + $0x40] sm:$0xff] }
 0x97c   :  { %v1215_v18 = vsel %vm158_vm6, %v1212_v16, 0.0 }
 0x988   :  { %1216 = vadd.xlane.f32.xlu0 %v1215_v18  ;;  %v1388_v18 = vld [vmem:[%s4981_s11 + $0x48] sm:$0xff] }
 0x9da   :  { %v1098_v19 = vpop.permute.xlu1 %1097 }
 0x9db   :  { %v1102_v20 = vsel %vm158_vm6, %v4358_v23, %v1098_v19  ;;  %v1096_v21 = vpop.permute.xlu0 %1095  ;;  %v3741_v19 = vpack.c.bf16 %v1388_v18, %v1387_v15  ;;  %v3110_v15 = vld [vmem:[%s4974_s4 + $0x60] sm:$0xff] }
 0x9dc   :  { %1104 = vst.msk [vmem:[#allocation2 + $0x11] sm:$0x1] %vm684_vm15, %v1102_v20  ;;  %v1101_v22 = vsel %vm158_vm6, %v4360_v28, %v1096_v21  ;;  %v1276_v28 = vld [vmem:[%s4979_s9] sm:$0xff]  ;;  %v1389_v20 = vld [vmem:[%s4981_s11 + $0x50] sm:$0xff]  ;;  %v1390_v21 = vld [vmem:[%s4981_s11 + $0x58] sm:$0xff] }
 0x9dd   :  { %1103 = vst.msk [vmem:[#allocation2 + $0x9] sm:$0xff] %vm682_vm14, %v1101_v22  ;;  %v3723_v30 = vpack.c.bf16 %v1277_v29, %v1276_v28  ;;  %v3744_v22 = vpack.c.bf16 %v1390_v21, %v1389_v20 }
 0x9df   :  { %3724 = vmatpush3.bf16.msra.mxu1 %v3723_v30 }
 0x9e0   :  { %3725 = vmatprep.subr.bf16.mxu1 %v4072_v49 }
 0x9e3   :  { %3727 = vmatpush3.bf16.msra.mxu1 %v3726_v39 }
 0x9e4   :  { %v1106_v31 = vld [vmem:[#allocation2 + $0x8] sm:$0xff]  ;;  %v1107_v25 = vld [vmem:[#allocation2 + $0x10] sm:$0x3]  ;;  %3728 = vmatprep.subr.bf16.mxu1 %v4072_v49 }
 0x9e5   :  { %3429 = vmatmul.mubr.msk.f32.gmra.mrb[16].mxu0 %vm682_vm14, %v1106_v31  ;;  %v1391_v31 = vld [vmem:[%s4981_s11 + $0x60] sm:$0xff] }
 0x9e6   :  { %3431 = vmatprep.mubr.msk.f32.mxu0 %vm4073_vm13, %v4068_v17 }
 0x9e9   :  { %3432 = vmatmul.mubr.msk.f32.gmra.mrb[18].mxu0 %vm682_vm14, %v1107_v25  ;;  %v1392_v25 = vld [vmem:[%s4981_s11 + $0x68] sm:$0xff] }
 0x9ea   :  { %1626 = vmatprep.mubr.f32.mxu0 %v4068_v17 }
 0xa15   :  { %v1217_v23 = vpop.xlane.xlu0 %1216 }
 0xa16   :  { %v1226_v33 = vmul.f32 0.03125, %v1217_v23  ;;  %v3747_v23 = vpack.c.bf16 %v1392_v25, %v1391_v31 }
 0xa18   :  { %v1229_v34 = vsub.f32 %v1212_v16, %v1226_v33  ;;  %v1393_v33 = vld [vmem:[%s4981_s11 + $0x70] sm:$0xff] }
 0xa1a   :  { %v1232_v35 = vmul.f32 %v1229_v34, %v1229_v34 }
 0xa1c   :  { %v1235_v36 = vsel %vm158_vm6, %v1232_v35, 0.0 }
 0xa1d   :  { %1236 = vadd.xlane.f32.xlu0 %v1235_v36 }
 0xaaa   :  { %v1237_v41 = vpop.xlane.xlu0 %1236 }
 0xaab   :  { %v1244_v42 = vmul.f32 0.03125, %v1237_v41 }
 0xaad   :  { %v1247_v43 = vadd.f32 1e-05, %v1244_v42 }
 0xaaf   :  { %3963 = vrsqrt.f32 %v1247_v43 }
 0xab8   :  { %v1203_v44 = vpop.f32.mrb[16].mxu0 }
 0xab9   :  { %v3964_v46 = vpop.eup %3963  ;;  %v1204_v48 = vadd.f32 %v3093_v14, %v1203_v44  ;;  %v3430_v50 = vpop.f32.mrb[17].mxu0 }
 0xaba   :  { %v1253_v52 = vmul.f32 %v3964_v46, %v1229_v34  ;;  %v1394_v34 = vld [vmem:[%s4981_s11 + $0x78] sm:$0xff] }
 0xabb   :  { %v1213_v53 = vadd.f32 %v1204_v48, %v4220_v24  ;;  %v3750_v35 = vpack.c.bf16 %v1394_v34, %v1393_v33 }
 0xabc   :  { %v1208_v37 = vpop.f32.mrb[18].mxu0  ;;  %v1263_v38 = vmul.f32 %v4458_v51, %v1253_v52  ;;  %v3099_v52 = vld [vmem:[%s4980_s10] ss:$0 sm:$0xff] }
 0xabd   :  { %v1209_v40 = vadd.f32 %v3093_v14, %v1208_v37  ;;  %v3433_v57 = vpop.f32.mrb[19].mxu0  ;;  %v1218_v58 = vsel %vm158_vm6, %v1213_v53, 0.0  ;;  %v1386_v14 = vld [vmem:[%s4981_s11 + $0x38] sm:$0xff] }
 0xabe   :  { %1219 = vadd.xlane.f32.xlu1 %v1218_v58  ;;  %v4469_v55 = vadd.f32 %v4464_v56, %v1263_v38  ;;  %v3738_v16 = vpack.c.bf16 %v1386_v14, %v1385_v13  ;;  %v3113_v13 = vld [vmem:[%s4974_s4 + $0x78] sm:$0xff] }
 0xabf   :  { %v1214_v59 = vadd.f32 %v1209_v40, %v4229_v26 }
 0xac0   :  { %3443 = vmatmul.mubr.msk.f32.vlgmr.msra.gmra.mrb[10].mxu1 %vm158_vm6, %v4469_v55 }
 0xac1   :  { %v1222_v24 = vsel %vm1221_vm0, %v1214_v59, 0.0  ;;  %3445 = vmatprep.mubr.msk.f32.mxu1 %vm4073_vm13, %v4068_v17  ;;  %3730 = vmatpush3.bf16.msra.mxu1 %v3729_v54 }
 0xac2   :  { %1223 = vadd.xlane.f32.xlu1 %v1222_v24  ;;  %3731 = vmatprep.subr.bf16.mxu1 %v4072_v49 }
 0xac5   :  { %3733 = vmatpush3.bf16.msra.mxu1 %v3732_v9  ;;  %v3752_v9 = vpack.c.bf16 %v3109_v8, %v3107_v7 }
 0xac6   :  { %3734 = vmatprep.subr.bf16.mxu1 %v4072_v49 }
 0xac7   :  { %3753 = vmatprep.subr.bf16.mxu0 %v3752_v9 }
 0xac9   :  { %3736 = vmatpush3.bf16.msra.mxu1 %v3735_v12  ;;  %v3111_v12 = vld [vmem:[%s4974_s4 + $0x68] sm:$0xff] }
 0xaca   :  { %3737 = vmatprep.subr.bf16.mxu1 %v4072_v49  ;;  %v3756_v14 = vpack.c.bf16 %v3113_v13, %v3111_v12 }
 0xacd   :  { %3739 = vmatpush3.bf16.msra.mxu1 %v3738_v16  ;;  %v3112_v16 = vld [vmem:[%s4974_s4 + $0x70] sm:$0xff] }
 0xace   :  { %3740 = vmatprep.subr.bf16.mxu1 %v4072_v49  ;;  %v3758_v18 = vpack.c.bf16 %v3112_v16, %v3110_v15 }
 0xad1   :  { %3742 = vmatpush3.bf16.msra.mxu1 %v3741_v19 }
 0xad2   :  { %3743 = vmatprep.subr.bf16.mxu1 %v4072_v49 }
 0xad5   :  { %3745 = vmatpush3.bf16.msra.mxu1 %v3744_v22 }
 0xad6   :  { %3746 = vmatprep.subr.bf16.mxu1 %v4072_v49 }
 0xad9   :  { %3748 = vmatpush3.bf16.msra.mxu1 %v3747_v23 }
 0xada   :  { %3749 = vmatprep.subr.bf16.mxu1 %v4072_v49 }
 0xadd   :  { %3751 = vmatpush3.bf16.msra.mxu1 %v3750_v35 }
 0xb4b   :  { %v1220_v26 = vpop.xlane.xlu1 %1219 }
 0xb4c   :  { %v1227_v62 = vmul.f32 0.03125, %v1220_v26 }
 0xb4e   :  { %v1230_v63 = vsub.f32 %v1213_v53, %v1227_v62 }
 0xb4f   :  { %v1224_v0 = vpop.xlane.xlu1 %1223 }
 0xb50   :  { %v1228_v1 = vmul.f32 0.03125, %v1224_v0  ;;  %v1233_v2 = vmul.f32 %v1230_v63, %v1230_v63 }
 0xb52   :  { %v1231_v3 = vsub.f32 %v1214_v59, %v1228_v1  ;;  %v1238_v4 = vsel %vm158_vm6, %v1233_v2, 0.0 }
 0xb53   :  { %1239 = vadd.xlane.f32.xlu0 %v1238_v4 }
 0xb54   :  { %v1234_v5 = vmul.f32 %v1231_v3, %v1231_v3 }
 0xb56   :  { %v1241_v6 = vsel %vm1221_vm0, %v1234_v5, 0.0 }
 0xb57   :  { %1242 = vadd.xlane.f32.xlu0 %v1241_v6 }
 0xb93   :  { %v1362_v36 = vpop.f32.mrb[10].mxu1 }
 0xb94   :  { %v3444_v28 = vpop.f32.mrb[11].mxu1  ;;  %v1363_v37 = vadd.f32 %v3099_v52, %v1362_v36 }
 0xb96   :  { %v1376_v40 = vmax.f32 %v1363_v37, 0.0 }
 0xbe0   :  { %v1240_v29 = vpop.xlane.xlu0 %1239 }
 0xbe1   :  { %v1245_v30 = vmul.f32 0.03125, %v1240_v29 }
 0xbe3   :  { %v1248_v32 = vadd.f32 1e-05, %v1245_v30 }
 0xbe4   :  { %v1243_v27 = vpop.xlane.xlu0 %1242 }
 0xbe5   :  { %3965 = vrsqrt.f32 %v1248_v32  ;;  %v1246_v39 = vmul.f32 0.03125, %v1243_v27  ;;  %v3104_v32 = vld [vmem:[%s4983_s13] ss:$0 sm:$0xff] }
 0xbe7   :  { %v1249_v41 = vadd.f32 1e-05, %v1246_v39  ;;  %v3105_v39 = vld [vmem:[%s4984_s14] ss:$0 sm:$0xff] }
 0xbe9   :  { %3967 = vrsqrt.f32 %v1249_v41 }
 0xbef   :  { %v3966_v42 = vpop.eup %3965 }
 0xbf0   :  { %v1254_v43 = vmul.f32 %v3966_v42, %v1230_v63 }
 0xbf2   :  { %v1264_v44 = vmul.f32 %v4458_v51, %v1254_v43 }
 0xbf3   :  { %v3968_v46 = vpop.eup %3967 }
 0xbf4   :  { %v1274_v48 = vadd.f32 %v4464_v56, %v1264_v44  ;;  %v1255_v50 = vmul.f32 %v3968_v46, %v1231_v3 }
 0xbf6   :  { %3446 = vmatmul.mubr.msk.f32.gmra.mrb[12].mxu1 %vm158_vm6, %v1274_v48  ;;  %v1265_v53 = vmul.f32 %v4458_v51, %v1255_v50 }
 0xbf7   :  { %3448 = vmatprep.mubr.msk.f32.mxu1 %vm4073_vm13, %v4068_v17 }
 0xbf8   :  { %v1275_v38 = vadd.f32 %v4464_v56, %v1265_v53  ;;  %v3103_v56 = vld [vmem:[%s4982_s12] ss:$0 sm:$0xff] }
 0xbfa   :  { %3449 = vmatmul.mubr.msk.f32.gmra.mrb[14].mxu1 %vm158_vm6, %v1275_v38 }
 0xbfb   :  { %3483 = vmatprep.mubr.msk.f32.mxu1 %vm4073_vm13, %v4068_v17 }
 0xbfe   :  { %3484 = vmatmul.mubr.f32.vlgmr.msra.gmra.mrb[16].mxu1 %v1376_v40 }
 0xbff   :  { %3486 = vmatprep.mubr.msk.f32.mxu1 %vm4073_vm13, %v4068_v17 }
 0xcc9   :  { %v1367_v57 = vpop.f32.mrb[12].mxu1 }
 0xcca   :  { %v1368_v58 = vadd.f32 %v3099_v52, %v1367_v57  ;;  %v3447_v59 = vpop.f32.mrb[13].mxu1 }
 0xccc   :  { %v1377_v51 = vmax.f32 %v1368_v58, 0.0 }
 0xccd   :  { %v1372_v24 = vpop.f32.mrb[14].mxu1 }
 0xcce   :  { %v1373_v60 = vadd.f32 %v3099_v52, %v1372_v24  ;;  %v3450_v61 = vpop.f32.mrb[15].mxu1  ;;  %3487 = vmatmul.mubr.f32.gmra.mrb[18].mxu1 %v1377_v51 }
 0xccf   :  { %3489 = vmatprep.mubr.msk.f32.mxu1 %vm4073_vm13, %v4068_v17 }
 0xcd0   :  { %v1378_v54 = vmax.f32 %v1373_v60, 0.0 }
 0xcd1   :  { %v1468_v26 = vpop.f32.mrb[16].mxu1 }
 0xcd2   :  { %v1469_v62 = vadd.f32 %v3103_v56, %v1468_v26  ;;  %v3485_v63 = vpop.f32.mrb[17].mxu1  ;;  %3490 = vmatmul.mubr.f32.gmra.mrb[20].mxu1 %v1378_v54 }
 0xcd4   :  { %v1482_v0 = vadd.f32 %v1469_v62, %v4469_v55  ;;  %v3106_v55 = vld [vmem:[%s4974_s4 + $0x40] sm:$0xff]  ;;  %s4019_s4 = scalar_lea.vmem %s3044_s1, 384 }
 0xcd5   :  { %v3754_v11 = vpack.c.bf16 %v3108_v10, %v3106_v55  ;;  %p4020_p0 = scmp.ne.s32.totalorder %s3044_s1, %s4019_s4  ;;  %p4025_p2 = scmp.lt.s32.totalorder %s4019_s4, %s4019_s4 }
 0xcd6   :  { %v1485_v1 = vsel %vm158_vm6, %v1482_v0, 0.0 }
 0xcd7   :  { %1486 = vadd.xlane.f32.xlu1 %v1485_v1  ;;  %3755 = vmatpush1.bf16.msra.mxu0 %v3754_v11  ;;  %p4026_p3 = por %p4025_p2, %p4024_p1 }
 0xcd8   :  { %3757 = vmatprep.subr.bf16.mxu0 %v3756_v14 }
 0xcd9   :  { %p4027_p4 = pnand %p4026_p3, %p4020_p0 }
 0xcdb   :  { %3759 = vmatpush1.bf16.msra.mxu0 %v3758_v18 }
 0xd64   :  { %v1487_v2 = vpop.xlane.xlu1 %1486 }
 0xd65   :  { %v1494_v3 = vmul.f32 0.03125, %v1487_v2 }
 0xd67   :  { %v1497_v4 = vsub.f32 %v1482_v0, %v1494_v3 }
 0xd69   :  { %v1500_v5 = vmul.f32 %v1497_v4, %v1497_v4 }
 0xd6b   :  { %v1503_v6 = vsel %vm158_vm6, %v1500_v5, 0.0 }
 0xd6c   :  { %1504 = vadd.xlane.f32.xlu1 %v1503_v6 }
 0xda1   :  { %v1473_v19 = vpop.f32.mrb[18].mxu1 }
 0xda2   :  { %v1474_v20 = vadd.f32 %v3103_v56, %v1473_v19  ;;  %v3488_v21 = vpop.f32.mrb[19].mxu1 }
 0xda4   :  { %v1483_v22 = vadd.f32 %v1474_v20, %v1274_v48 }
 0xda5   :  { %v1478_v31 = vpop.f32.mrb[20].mxu1 }
 0xda6   :  { %v1479_v25 = vadd.f32 %v3103_v56, %v1478_v31  ;;  %v3491_v23 = vpop.f32.mrb[21].mxu1  ;;  %v1488_v33 = vsel %vm158_vm6, %v1483_v22, 0.0 }
 0xda7   :  { %1489 = vadd.xlane.f32.xlu0 %v1488_v33 }
 0xda8   :  { %v1484_v34 = vadd.f32 %v1479_v25, %v1275_v38 }
 0xdaa   :  { %v1491_v35 = vsel %vm1221_vm0, %v1484_v34, 0.0 }
 0xdab   :  { %1492 = vadd.xlane.f32.xlu1 %v1491_v35 }
 0xdf9   :  { %v1505_v36 = vpop.xlane.xlu1 %1504 }
 0xdfa   :  { %v1512_v28 = vmul.f32 0.03125, %v1505_v36 }
 0xdfc   :  { %v1515_v29 = vadd.f32 1e-05, %v1512_v28 }
 0xdfe   :  { %3969 = vrsqrt.f32 %v1515_v29 }
 0xe08   :  { %v3970_v30 = vpop.eup %3969 }
 0xe09   :  { %v1521_v27 = vmul.f32 %v3970_v30, %v1497_v4 }
 0xe0b   :  { %v1531_v41 = vmul.f32 %v3104_v32, %v1521_v27 }
 0xe0d   :  { %v4589_v42 = vadd.f32 %v3105_v39, %v1531_v41 }
 0xe0f   :  { %3114 = vmatmul.mubr.msk.f32.vlgmr.msra.gmra.mrb[20].mxu0 %vm158_vm6, %v4589_v42 }
 0xe10   :  { %1632 = vmatprep.mubr.f32.mxu0 %v4068_v17 }
 0xe34   :  { %v1490_v43 = vpop.xlane.xlu0 %1489 }
 0xe35   :  { %v1495_v44 = vmul.f32 0.03125, %v1490_v43 }
 0xe37   :  { %v1498_v46 = vsub.f32 %v1483_v22, %v1495_v44 }
 0xe38   :  { %v1493_v48 = vpop.xlane.xlu1 %1492 }
 0xe39   :  { %v1496_v50 = vmul.f32 0.03125, %v1493_v48  ;;  %v1501_v52 = vmul.f32 %v1498_v46, %v1498_v46 }
 0xe3b   :  { %v1499_v53 = vsub.f32 %v1484_v34, %v1496_v50  ;;  %v1506_v37 = vsel %vm158_vm6, %v1501_v52, 0.0 }
 0xe3c   :  { %1507 = vadd.xlane.f32.xlu0 %v1506_v37 }
 0xe3d   :  { %v1502_v38 = vmul.f32 %v1499_v53, %v1499_v53 }
 0xe3f   :  { %v1509_v40 = vsel %vm1221_vm0, %v1502_v38, 0.0 }
 0xe40   :  { %1510 = vadd.xlane.f32.xlu0 %v1509_v40 }
 0xec9   :  { %v1508_v57 = vpop.xlane.xlu0 %1507 }
 0xeca   :  { %v1513_v58 = vmul.f32 0.03125, %v1508_v57 }
 0xecc   :  { %v1516_v59 = vadd.f32 1e-05, %v1513_v58 }
 0xecd   :  { %v1511_v51 = vpop.xlane.xlu0 %1510 }
 0xece   :  { %3971 = vrsqrt.f32 %v1516_v59  ;;  %v1514_v24 = vmul.f32 0.03125, %v1511_v51 }
 0xed0   :  { %v1517_v60 = vadd.f32 1e-05, %v1514_v24 }
 0xed2   :  { %3973 = vrsqrt.f32 %v1517_v60 }
 0xed8   :  { %v3972_v61 = vpop.eup %3971 }
 0xed9   :  { %v1522_v56 = vmul.f32 %v3972_v61, %v1498_v46 }
 0xedb   :  { %v1532_v54 = vmul.f32 %v3104_v32, %v1522_v56 }
 0xedc   :  { %v3974_v26 = vpop.eup %3973 }
 0xedd   :  { %v4596_v62 = vadd.f32 %v3105_v39, %v1532_v54  ;;  %v1523_v63 = vmul.f32 %v3974_v26, %v1499_v53 }
 0xedf   :  { %3115 = vmatmul.mubr.msk.f32.gmra.mrb[22].mxu0 %vm158_vm6, %v4596_v62  ;;  %v1533_v0 = vmul.f32 %v3104_v32, %v1523_v63 }
 0xee0   :  { %1638 = vmatprep.mubr.f32.mxu0 %v4068_v17 }
 0xee1   :  { %v4601_v1 = vadd.f32 %v3105_v39, %v1533_v0 }
 0xee2   :  { %v1628_v2 = vpop.f32.mrb[20].mxu0 }
 0xee3   :  { %v4603_v3 = vpop.f32.mrb[21].mxu0  ;;  %3116 = vmatmul.mubr.msk.f32.gmra.mrb[24].mxu0 %vm158_vm6, %v4601_v1 }
 0xee4   :  { %3496 = vmatprep.mubr.msk.f32.mxu0 %vm158_vm6, %v1628_v2 }
 0xfb2   :  { %v1634_v4 = vpop.f32.mrb[22].mxu0 }
 0xfb3   :  { %v4608_v5 = vpop.f32.mrb[23].mxu0  ;;  %v3901_v6 = vpack.i.bf16 %v1634_v4, %v1628_v2  ;;  %v2059_v55 = vrot.slane %v1634_v4, 1 }
 0xfb4   :  { %v3916_v7 = vpack.i.bf16 %v4608_v5, %v4603_v3  ;;  %v3766_v8 = vpack.c.bf16 %v4608_v5, %v4603_v3  ;;  %v2174_v12 = vrot.slane %v4608_v5, 1 }
 0xfb5   :  { %3902 = vrot.lane.b32.xlu1 %v3901_v6, %s4070_s28 }
 0xfb6   :  { %v1640_v9 = vpop.f32.mrb[24].mxu0 }
 0xfb7   :  { %v4615_v10 = vrot.slane %v1640_v9, 1  ;;  %v1642_v11 = vpop.f32.mrb[25].mxu0 }
 0xfb8   :  { %v4618_v13 = vrot.slane %v1642_v11, 1 }
 0xfb9   :  { %3907 = vrot.lane.b32.xlu1 %v3901_v6, %s4071_s29  ;;  %v4623_v14 = vsel %vm687_vm7, %v2059_v55, %v4615_v10 }
 0xfba   :  { %v4627_v15 = vsel %vm687_vm7, %v2174_v12, %v4618_v13  ;;  %v4631_v16 = vpack.i.bf16 %v4615_v10, %v4623_v14 }
 0xfbb   :  { %v4635_v18 = vpack.c.bf16 %v4618_v13, %v4627_v15  ;;  %v3926_v19 = vpack.i.bf16 %v4618_v13, %v4627_v15  ;;  %v3145_v13 = vld [vmem:[%s4975_s5 + $0x40] sm:$0xff]  ;;  %v3146_v15 = vld [vmem:[%s4975_s5 + $0x48] sm:$0xff] }
 0xfbd   :  { %3912 = vrot.lane.b32.xlu1 %v4631_v16, %s4070_s28 }
 0xfc1   :  { %1844 = vrot.lane.b32.xlu1 %v1634_v4, %s4069_s3 }
0x1027   :  { %v3903_v20 = vpop.permute.xlu1 %3902 }
0x1028   :  { %v3905_v21 = vunpack.i.h.bf16 %v3903_v20  ;;  %v3904_v22 = vunpack.i.l.bf16 %v3903_v20 }
0x102a   :  { %v3760_v31 = vpack.c.bf16 %v3905_v21, %v3904_v22 }
0x102b   :  { %v3908_v25 = vpop.permute.xlu1 %3907 }
0x102c   :  { %3762 = vmatprep.subr.msk.bf16.mxu0 %vm4266_vm9, %v3760_v31  ;;  %v3910_v23 = vunpack.i.h.bf16 %v3908_v25  ;;  %v3909_v33 = vunpack.i.l.bf16 %v3908_v25 }
0x102d   :  { %3765 = vmatpush3.bf16.xpose.msk.msra.mxu0 %vm4266_vm9, %v3760_v31 }
0x102e   :  { %3768 = vmatprep.subr.msk.bf16.mxu0 %vm4271_vm10, %v3766_v8  ;;  %v3772_v34 = vpack.c.bf16 %v3910_v23, %v3909_v33 }
0x102f   :  { %v3913_v57 = vpop.permute.xlu1 %3912 }
0x1030   :  { %v3915_v59 = vunpack.i.h.bf16 %v3913_v57  ;;  %v3914_v51 = vunpack.i.l.bf16 %v3913_v57 }
0x1032   :  { %v3784_v61 = vpack.c.bf16 %v3915_v59, %v3914_v51 }
0x1033   :  { %v1845_v54 = vpop.permute.xlu1 %1844 }
0x1034   :  { %3497 = vmatmul.mubr.msk.f32.vlgmr.msra.gmra.mrb[26].mxu0 %vm158_vm6, %v1634_v4 }
0x1035   :  { %3771 = vmatpush3.bf16.msk.msra.mxu0 %vm4271_vm10, %v3766_v8 }
0x1036   :  { %3774 = vmatprep.subr.msk.bf16.mxu0 %vm4266_vm9, %v3772_v34 }
0x1107   :  { %v3498_v35 = vpop.f32.mrb[26].mxu0 }
0x1108   :  { %v1725_v36 = vpop.f32.mrb[27].mxu0  ;;  %v1735_v29 = vmul.f32 0.17677669, %v3498_v35 }
0x1109   :  { %v1734_v28 = vmul.f32 0.17677669, %v1725_v36 }
0x110a   :  { %v1739_v32 = vsel %vm363_vm11, %v1735_v29, -inf }
0x110b   :  { %v1736_v30 = vsel %vm359_vm12, %v1734_v28, -inf }
0x110c   :  { %1737 = vmax.xlane.f32.xlu0 %v1736_v30 }
0x1110   :  { %1740 = vmax.xlane.f32.xlu0 %v1739_v32 }
0x1199   :  { %v1738_v27 = vpop.xlane.xlu0 %1737 }
0x119a   :  { %v1742_v39 = vsub.f32 %v1734_v28, %v1738_v27 }
0x119c   :  { %v1744_v41 = vmul.f32 1.442695, %v1742_v39 }
0x119d   :  { %v1741_v43 = vpop.xlane.xlu0 %1740 }
0x119e   :  { %3975 = vpow2.f32 %v1744_v41  ;;  %v1743_v44 = vsub.f32 %v1735_v29, %v1741_v43 }
0x11a0   :  { %v1746_v46 = vmul.f32 1.442695, %v1743_v44 }
0x11a2   :  { %3977 = vpow2.f32 %v1746_v46 }
0x11a8   :  { %v3976_v48 = vpop.eup %3975 }
0x11a9   :  { %v1748_v50 = vsel %vm359_vm12, %v3976_v48, 0.0 }
0x11aa   :  { %1749 = vadd.xlane.f32.xlu0 %v1748_v50 }
0x11ac   :  { %v3978_v52 = vpop.eup %3977 }
0x11ad   :  { %v1751_v53 = vsel %vm363_vm11, %v3978_v52, 0.0 }
0x11ae   :  { %1752 = vadd.xlane.f32.xlu0 %v1751_v53 }
0x11c4   :  { %1842 = vrot.lane.b32.xlu0 %v1628_v2, %s4069_s3 }
0x1237   :  { %v1750_v37 = vpop.xlane.xlu0 %1749 }
0x1238   :  { %3979 = vrcp.f32 %v1750_v37 }
0x123b   :  { %v1753_v38 = vpop.xlane.xlu0 %1752 }
0x123c   :  { %3981 = vrcp.f32 %v1753_v38 }
0x123f   :  { %v1843_v56 = vpop.permute.xlu0 %1842 }
0x1242   :  { %v3980_v40 = vpop.eup %3979 }
0x1243   :  { %v1756_v58 = vmul.f32 %v3980_v40, %v3976_v48 }
0x1245   :  { %3503 = vmatprep.mubr.msk.f32.mxu0 %vm359_vm12, %v1756_v58 }
0x1246   :  { %v3982_v24 = vpop.eup %3981 }
0x1247   :  { %v1757_v60 = vmul.f32 %v3982_v24, %v3978_v52 }
0x1249   :  { %3504 = vmatmul.mubr.msk.f32.vlgmr.msra.gmra.mrb[28].mxu0 %vm359_vm12, %v1757_v60 }
0x124a   :  { %3777 = vmatpush3.bf16.xpose.msk.msra.mxu0 %vm4266_vm9, %v3772_v34  ;;  %3510 = vmatprep.mubr.msk.f32.mxu0 %vm158_vm6, %v1843_v56 }
0x124b   :  { %3786 = vmatprep.subr.msk.bf16.mxu0 %vm4266_vm9, %v3784_v61 }
0x1251   :  { %3511 = vmatmul.mubr.msk.f32.vlgmr.msra.gmra.mrb[30].mxu0 %vm158_vm6, %v1845_v54 }
0x1252   :  { %3789 = vmatpush3.bf16.xpose.msk.msra.mxu0 %vm4266_vm9, %v3784_v61  ;;  %3524 = vmatprep.mubr.msk.f32.mxu0 %vm158_vm6, %v4623_v14 }
0x1259   :  { %3525 = vmatmul.mubr.msk.f32.vlgmr.msra.gmra.mrb[32].mxu0 %vm158_vm6, %v4615_v10 }
0x131c   :  { %v4672_v26 = vpop.f32.mrb[28].mxu0 }
0x131d   :  { %v4674_v63 = vpop.f32.mrb[29].mxu0 }
0x1324   :  { %v3512_v0 = vpop.f32.mrb[30].mxu0 }
0x1325   :  { %v1934_v2 = vmul.f32 0.17677669, %v3512_v0  ;;  %v1924_v4 = vpop.f32.mrb[31].mxu0 }
0x1326   :  { %v1933_v6 = vmul.f32 0.17677669, %v1924_v4 }
0x1327   :  { %v1938_v8 = vsel %vm363_vm11, %v1934_v2, -inf }
0x1328   :  { %1939 = vmax.xlane.f32.xlu0 %v1938_v8  ;;  %v1935_v9 = vsel %vm359_vm12, %v1933_v6, -inf }
0x1329   :  { %1936 = vmax.xlane.f32.xlu1 %v1935_v9 }
0x132c   :  { %v3526_v55 = vpop.f32.mrb[32].mxu0 }
0x132d   :  { %v2140_v11 = vpop.f32.mrb[33].mxu0  ;;  %v2150_v20 = vmul.f32 0.17677669, %v3526_v55 }
0x132e   :  { %v2149_v12 = vmul.f32 0.17677669, %v2140_v11 }
0x132f   :  { %v2154_v22 = vsel %vm363_vm11, %v2150_v20, -inf }
0x1330   :  { %v2151_v21 = vsel %vm359_vm12, %v2149_v12, -inf }
0x1331   :  { %2152 = vmax.xlane.f32.xlu1 %v2151_v21 }
0x1335   :  { %2155 = vmax.xlane.f32.xlu1 %v2154_v22 }
0x13b5   :  { %v1940_v31 = vpop.xlane.xlu0 %1939 }
0x13b6   :  { %v1942_v25 = vsub.f32 %v1934_v2, %v1940_v31  ;;  %v1937_v23 = vpop.xlane.xlu1 %1936 }
0x13b7   :  { %v1941_v33 = vsub.f32 %v1933_v6, %v1937_v23 }
0x13b8   :  { %v1945_v34 = vmul.f32 1.442695, %v1942_v25 }
0x13b9   :  { %v1943_v35 = vmul.f32 1.442695, %v1941_v33 }
0x13ba   :  { %3983 = vpow2.f32 %v1945_v34 }
0x13bb   :  { %3985 = vpow2.f32 %v1943_v35 }
0x13be   :  { %v2153_v36 = vpop.xlane.xlu1 %2152 }
0x13bf   :  { %v2157_v28 = vsub.f32 %v2149_v12, %v2153_v36 }
0x13c1   :  { %v2159_v29 = vmul.f32 1.442695, %v2157_v28 }
0x13c2   :  { %v2156_v30 = vpop.xlane.xlu1 %2155 }
0x13c3   :  { %3987 = vpow2.f32 %v2159_v29  ;;  %v2158_v32 = vsub.f32 %v2150_v20, %v2156_v30 }
0x13c4   :  { %v3984_v27 = vpop.eup %3983 }
0x13c5   :  { %v3986_v39 = vpop.eup %3985  ;;  %v2161_v41 = vmul.f32 1.442695, %v2158_v32  ;;  %v1950_v43 = vsel %vm363_vm11, %v3984_v27, 0.0 }
0x13c6   :  { %1951 = vadd.xlane.f32.xlu1 %v1950_v43  ;;  %v1947_v44 = vsel %vm359_vm12, %v3986_v39, 0.0 }
0x13c7   :  { %3989 = vpow2.f32 %v2161_v41  ;;  %1948 = vadd.xlane.f32.xlu0 %v1947_v44 }
0x13cd   :  { %v3988_v46 = vpop.eup %3987 }
0x13ce   :  { %v2163_v48 = vsel %vm359_vm12, %v3988_v46, 0.0 }
0x13cf   :  { %2164 = vadd.xlane.f32.xlu0 %v2163_v48 }
0x13d1   :  { %v3990_v50 = vpop.eup %3989 }
0x13d2   :  { %v2166_v52 = vsel %vm363_vm11, %v3990_v50, 0.0 }
0x13d3   :  { %2167 = vadd.xlane.f32.xlu1 %v2166_v52  ;;  %v3809_v52 = vpack.c.bf16 %v3146_v15, %v3145_v13 }
0x13e4   :  { %3922 = vrot.lane.b32.xlu1 %v4631_v16, %s4071_s29 }
0x13e5   :  { %3917 = vrot.lane.b32.xlu0 %v3916_v7, %s4069_s3 }
0x13e8   :  { %2261 = vrot.lane.b32.xlu1 %v4623_v14, %s4069_s3 }
0x13e9   :  { %2263 = vrot.lane.b32.xlu0 %v4615_v10, %s4069_s3 }
0x1453   :  { %v1952_v37 = vpop.xlane.xlu1 %1951 }
0x1454   :  { %v1949_v53 = vpop.xlane.xlu0 %1948 }
0x1455   :  { %3991 = vrcp.f32 %v1949_v53 }
0x1456   :  { %3993 = vrcp.f32 %v1952_v37  ;;  %v3147_v37 = vld [vmem:[%s4975_s5 + $0x50] sm:$0xff] }
0x145c   :  { %v2165_v38 = vpop.xlane.xlu0 %2164 }
0x145d   :  { %3995 = vrcp.f32 %v2165_v38  ;;  %v3148_v38 = vld [vmem:[%s4975_s5 + $0x58] sm:$0xff] }
0x145e   :  { %v3812_v47 = vpack.c.bf16 %v3148_v38, %v3147_v37 }
0x145f   :  { %v3992_v40 = vpop.eup %3991 }
0x1460   :  { %v3918_v57 = vpop.permute.xlu0 %3917  ;;  %v2168_v16 = vpop.xlane.xlu1 %2167  ;;  %v1955_v58 = vmul.f32 %v3992_v40, %v3986_v39  ;;  %v3149_v40 = vld [vmem:[%s4975_s5 + $0x60] sm:$0xff] }
0x1461   :  { %v3920_v59 = vunpack.i.h.bf16 %v3918_v57  ;;  %v3919_v51 = vunpack.i.l.bf16 %v3918_v57  ;;  %3997 = vrcp.f32 %v2168_v16  ;;  %v3994_v5 = vpop.eup %3993  ;;  %v3150_v57 = vld [vmem:[%s4975_s5 + $0x68] sm:$0xff] }
0x1462   :  { %3517 = vmatprep.mubr.msk.f32.mxu1 %vm359_vm12, %v1955_v58  ;;  %v1956_v60 = vmul.f32 %v3994_v5, %v3984_v27  ;;  %v3815_v16 = vpack.c.bf16 %v3150_v57, %v3149_v40  ;;  %v3151_v58 = vld [vmem:[%s4975_s5 + $0x70] sm:$0xff]  ;;  %v3172_v40 = vld [vmem:[%s4981_s11 + $0x88] sm:$0xff] }
0x1463   :  { %v3778_v3 = vpack.c.bf16 %v3920_v59, %v3919_v51  ;;  %v3152_v59 = vld [vmem:[%s4975_s5 + $0x78] sm:$0xff]  ;;  %v3173_v57 = vld [vmem:[%s4981_s11 + $0x90] sm:$0xff] }
0x1464   :  { %v3923_v7 = vpop.permute.xlu1 %3922  ;;  %v2264_v4 = vpop.permute.xlu0 %2263  ;;  %v3818_v51 = vpack.c.bf16 %v3152_v59, %v3151_v58  ;;  %v3174_v58 = vld [vmem:[%s4981_s11 + $0x98] sm:$0xff] }
0x1465   :  { %v3925_v14 = vunpack.i.h.bf16 %v3923_v7  ;;  %v3924_v10 = vunpack.i.l.bf16 %v3923_v7  ;;  %3780 = vmatprep.subr.msk.bf16.mxu1 %vm4271_vm10, %v3778_v3  ;;  %v3830_v59 = vpack.c.bf16 %v3174_v58, %v3173_v57 }
0x1466   :  { %3783 = vmatpush3.bf16.msk.msra.mxu1 %vm4271_vm10, %v3778_v3 }
0x1467   :  { %v3996_v24 = vpop.eup %3995  ;;  %3792 = vmatprep.subr.msk.bf16.mxu1 %vm4271_vm10, %v4635_v18  ;;  %v3796_v56 = vpack.c.bf16 %v3925_v14, %v3924_v10 }
0x1468   :  { %v2171_v61 = vmul.f32 %v3996_v24, %v3988_v46  ;;  %v2262_v2 = vpop.permute.xlu1 %2261  ;;  %v3154_v24 = vld [vmem:[%s4976_s6 + $0x1] ss:$0 sm:$0xff] }
0x1469   :  { %3518 = vmatmul.mubr.msk.f32.vlgmr.msra.gmra.mrb[22].mxu1 %vm359_vm12, %v1956_v60 }
0x146a   :  { %3795 = vmatpush3.bf16.msk.msra.mxu1 %vm4271_vm10, %v4635_v18  ;;  %3531 = vmatprep.mubr.msk.f32.mxu1 %vm359_vm12, %v2171_v61 }
0x146b   :  { %v3998_v54 = vpop.eup %3997  ;;  %3798 = vmatprep.subr.msk.bf16.mxu1 %vm4266_vm9, %v3796_v56 }
0x146c   :  { %v2172_v0 = vmul.f32 %v3998_v54, %v3990_v50 }
0x146e   :  { %3532 = vmatmul.mubr.msk.f32.vlgmr.msra.gmra.mrb[24].mxu1 %vm359_vm12, %v2172_v0 }
0x146f   :  { %3538 = vmatprep.mubr.msk.f32.mxu1 %vm158_vm6, %v2262_v2 }
0x1473   :  { %3801 = vmatpush3.bf16.xpose.msk.msra.mxu1 %vm4266_vm9, %v3796_v56 }
0x1474   :  { %3820 = vmatprep.subr.bf16.mxu1 %v4072_v49 }
0x147a   :  { %3539 = vmatmul.mubr.msk.f32.vlgmr.msra.gmra.mrb[26].mxu1 %vm158_vm6, %v2264_v4 }
0x147b   :  { %3581 = vmatprep.mubr.msk.f32.mxu1 %vm4073_vm13, %v4068_v17 }
0x153c   :  { %v3519_v18 = vpop.f32.mrb[22].mxu1 }
0x153d   :  { %v2037_v6 = vpop.f32.mrb[23].mxu1 }
0x1541   :  { %v4717_v8 = vpop.f32.mrb[24].mxu1 }
0x1542   :  { %v4719_v9 = vpop.f32.mrb[25].mxu1 }
0x154d   :  { %v3540_v55 = vpop.f32.mrb[26].mxu1 }
0x154e   :  { %v2353_v11 = vmul.f32 0.17677669, %v3540_v55  ;;  %v2343_v12 = vpop.f32.mrb[27].mxu1 }
0x154f   :  { %v2352_v20 = vmul.f32 0.17677669, %v2343_v12 }
0x1550   :  { %v2357_v45 = vsel %vm363_vm11, %v2353_v11, -inf }
0x1551   :  { %2358 = vmax.xlane.f32.xlu0 %v2357_v45  ;;  %v2354_v21 = vsel %vm359_vm12, %v2352_v20, -inf }
0x1552   :  { %2355 = vmax.xlane.f32.xlu1 %v2354_v21 }
0x15de   :  { %v2359_v22 = vpop.xlane.xlu0 %2358 }
0x15df   :  { %v2361_v31 = vsub.f32 %v2353_v11, %v2359_v22  ;;  %v2356_v25 = vpop.xlane.xlu1 %2355 }
0x15e0   :  { %v2360_v23 = vsub.f32 %v2352_v20, %v2356_v25 }
0x15e1   :  { %v2364_v33 = vmul.f32 1.442695, %v2361_v31 }
0x15e2   :  { %v2362_v34 = vmul.f32 1.442695, %v2360_v23 }
0x15e3   :  { %3999 = vpow2.f32 %v2364_v33 }
0x15e4   :  { %4001 = vpow2.f32 %v2362_v34 }
0x15ed   :  { %v4000_v35 = vpop.eup %3999 }
0x15ee   :  { %v4002_v36 = vpop.eup %4001  ;;  %v2369_v28 = vsel %vm363_vm11, %v4000_v35, 0.0 }
0x15ef   :  { %2370 = vadd.xlane.f32.xlu1 %v2369_v28  ;;  %v2366_v29 = vsel %vm359_vm12, %v4002_v36, 0.0  ;;  %v3165_v28 = vld [vmem:[%s4979_s9 + $0x38] sm:$0xff] }
0x15f0   :  { %2367 = vadd.xlane.f32.xlu0 %v2366_v29 }
0x1600   :  { %2048 = vrot.lane.b32.xlu1 %v2037_v6, %s4071_s29 }
0x1604   :  { %2050 = vrot.lane.b32.xlu1 %v3519_v18, %s4071_s29 }
0x1606   :  { %3927 = vrot.lane.b32.xlu0 %v3926_v19, %s4069_s3 }
0x167c   :  { %v2371_v30 = vpop.xlane.xlu1 %2370 }
0x167d   :  { %4003 = vrcp.f32 %v2371_v30  ;;  %v2368_v32 = vpop.xlane.xlu0 %2367 }
0x167e   :  { %4005 = vrcp.f32 %v2368_v32 }
0x1680   :  { %v2049_v27 = vpop.permute.xlu1 %2048 }
0x1681   :  { %v2054_v39 = vsel %vm158_vm6, %v4674_v63, %v2049_v27  ;;  %v3928_v41 = vpop.permute.xlu0 %3927 }
0x1682   :  { %2056 = vst.msk [vmem:[#allocation2] sm:$0xff] %vm682_vm14, %v2054_v39  ;;  %v3930_v43 = vunpack.i.h.bf16 %v3928_v41  ;;  %v3929_v44 = vunpack.i.l.bf16 %v3928_v41 }
0x1684   :  { %v3802_v46 = vpack.c.bf16 %v3930_v43, %v3929_v44  ;;  %v2051_v48 = vpop.permute.xlu1 %2050 }
0x1685   :  { %v2055_v50 = vsel %vm158_vm6, %v4672_v26, %v2051_v48 }
0x1686   :  { %2057 = vst.msk [vmem:[#allocation2 + $0x8] sm:$0x1] %vm684_vm15, %v2055_v50  ;;  %3804 = vmatprep.subr.msk.bf16.mxu0 %vm4271_vm10, %v3802_v46 }
0x1687   :  { %v4004_v19 = vpop.eup %4003  ;;  %3807 = vmatpush3.bf16.msk.msra.mxu0 %vm4271_vm10, %v3802_v46 }
0x1688   :  { %v4006_v63 = vpop.eup %4005  ;;  %3808 = vmatprep.subr.bf16.mxu0 %v4072_v49  ;;  %v2375_v53 = vmul.f32 %v4004_v19, %v4000_v35  ;;  %v3163_v35 = vld [vmem:[%s4979_s9 + $0x28] sm:$0xff] }
0x1689   :  { %v2374_v26 = vmul.f32 %v4006_v63, %v4002_v36  ;;  %v2476_v3 = vld [vmem:[#allocation2] sm:$0xff] }
0x168b   :  { %3545 = vmatprep.mubr.msk.f32.mxu0 %vm359_vm12, %v2374_v26  ;;  %v3159_v26 = vld [vmem:[%s4977_s7 + $0x1] ss:$0 sm:$0xff] }
0x168c   :  { %3546 = vmatmul.mubr.msk.f32.vlgmr.msra.gmra.mrb[34].mxu0 %vm359_vm12, %v2375_v53  ;;  %v3161_v53 = vld [vmem:[%s4978_s8 + $0x1] ss:$0 sm:$0xff] }
0x168d   :  { %3810 = vmatpush3.bf16.msra.mxu0 %v3809_v52  ;;  %3564 = vmatprep.mubr.msk.f32.mxu0 %vm4073_vm13, %v4068_v17 }
0x168e   :  { %3811 = vmatprep.subr.bf16.mxu0 %v4072_v49 }
0x1691   :  { %3813 = vmatpush3.bf16.msra.mxu0 %v3812_v47  ;;  %v3171_v47 = vld [vmem:[%s4981_s11 + $0x80] sm:$0xff] }
0x1692   :  { %3814 = vmatprep.subr.bf16.mxu0 %v4072_v49 }
0x1695   :  { %3816 = vmatpush3.bf16.msra.mxu0 %v3815_v16  ;;  %v3827_v16 = vpack.c.bf16 %v3172_v40, %v3171_v47 }
0x1696   :  { %3817 = vmatprep.subr.bf16.mxu0 %v4072_v49 }
0x1699   :  { %3819 = vmatpush3.bf16.msra.mxu0 %v3818_v51  ;;  %v3175_v51 = vld [vmem:[%s4981_s11 + $0xa0] sm:$0xff] }
0x169a   :  { %3850 = vmatprep.subr.bf16.mxu0 %v4072_v49 }
0x169c   :  { %3565 = vmatmul.mubr.msk.f32.vlgmr.msra.gmra.mrb[36].mxu0 %vm682_vm14, %v2476_v3  ;;  %v3176_v3 = vld [vmem:[%s4981_s11 + $0xa8] sm:$0xff] }
0x169d   :  { %3567 = vmatprep.mubr.msk.f32.mxu0 %vm4073_vm13, %v4068_v17 }
0x175f   :  { %v3547_v5 = vpop.f32.mrb[34].mxu0 }
0x1760   :  { %2468 = vrot.lane.b32.xlu1 %v3547_v5, %s4071_s29  ;;  %v2455_v7 = vpop.f32.mrb[35].mxu0  ;;  %v3833_v5 = vpack.c.bf16 %v3176_v3, %v3175_v51 }
0x1761   :  { %2466 = vrot.lane.b32.xlu0 %v2455_v7, %s4071_s29  ;;  %v3177_v7 = vld [vmem:[%s4981_s11 + $0xb0] sm:$0xff] }
0x176f   :  { %v2571_v14 = vpop.f32.mrb[36].mxu0 }
0x1770   :  { %v3566_v10 = vpop.f32.mrb[37].mxu0  ;;  %v2572_v60 = vadd.f32 %v3154_v24, %v2571_v14  ;;  %v3178_v14 = vld [vmem:[%s4981_s11 + $0xb8] sm:$0xff] }
0x1771   :  { %v3836_v10 = vpack.c.bf16 %v3178_v14, %v3177_v7  ;;  %v2923_v14 = vld [vmem:[%s4985_s15] sm:$0xff] }
0x1772   :  { %v2585_v61 = vadd.f32 %v2572_v60, %v4589_v42  ;;  %v3180_v60 = vld [vmem:[%s4981_s11 + $0xc8] sm:$0xff] }
0x1774   :  { %v2588_v56 = vsel %vm158_vm6, %v2585_v61, 0.0 }
0x1780   :  { %2589 = vadd.xlane.f32.xlu0 %v2588_v56  ;;  %v3181_v56 = vld [vmem:[%s4981_s11 + $0xd0] sm:$0xff] }
0x17d2   :  { %v2469_v54 = vpop.permute.xlu1 %2468 }
0x17d3   :  { %v2473_v0 = vsel %vm158_vm6, %v4717_v8, %v2469_v54  ;;  %v2467_v2 = vpop.permute.xlu0 %2466  ;;  %v3182_v54 = vld [vmem:[%s4981_s11 + $0xd8] sm:$0xff] }
0x17d4   :  { %2475 = vst.msk [vmem:[#allocation2 + $0x11] sm:$0x1] %vm684_vm15, %v2473_v0  ;;  %v2472_v4 = vsel %vm158_vm6, %v4719_v9, %v2467_v2  ;;  %v3842_v0 = vpack.c.bf16 %v3182_v54, %v3181_v56  ;;  %v3183_v2 = vld [vmem:[%s4981_s11 + $0xe0] sm:$0xff] }
0x17d5   :  { %2474 = vst.msk [vmem:[#allocation2 + $0x9] sm:$0xff] %vm682_vm14, %v2472_v4  ;;  %v3184_v4 = vld [vmem:[%s4981_s11 + $0xe8] sm:$0xff] }
0x17dc   :  { %v2477_v18 = vld [vmem:[#allocation2 + $0x8] sm:$0xff]  ;;  %v2478_v42 = vld [vmem:[#allocation2 + $0x10] sm:$0x3] }
0x17dd   :  { %3568 = vmatmul.mubr.msk.f32.gmra.mrb[38].mxu0 %vm682_vm14, %v2477_v18  ;;  %v3845_v18 = vpack.c.bf16 %v3184_v4, %v3183_v2 }
0x17de   :  { %3570 = vmatprep.mubr.msk.f32.mxu0 %vm4073_vm13, %v4068_v17 }
0x17e1   :  { %3571 = vmatmul.mubr.msk.f32.gmra.mrb[40].mxu0 %vm682_vm14, %v2478_v42  ;;  %v3185_v42 = vld [vmem:[%s4981_s11 + $0xf0] sm:$0xff] }
0x17e2   :  { %3639 = vmatprep.mubr.msk.f32.mxu0 %vm4073_vm13, %v4068_v17 }
0x180d   :  { %v2590_v6 = vpop.xlane.xlu0 %2589 }
0x180e   :  { %v2597_v55 = vmul.f32 0.03125, %v2590_v6  ;;  %v3186_v6 = vld [vmem:[%s4981_s11 + $0xf8] sm:$0xff] }
0x1810   :  { %v2600_v45 = vsub.f32 %v2585_v61, %v2597_v55 }
0x1812   :  { %v2603_v33 = vmul.f32 %v2600_v45, %v2600_v45 }
0x1814   :  { %v2606_v34 = vsel %vm158_vm6, %v2603_v33, 0.0 }
0x18b0   :  { %v2576_v8 = vpop.f32.mrb[38].mxu0 }
0x18b1   :  { %v2577_v11 = vadd.f32 %v3154_v24, %v2576_v8  ;;  %v3569_v12 = vpop.f32.mrb[39].mxu0  ;;  %v3848_v8 = vpack.c.bf16 %v3186_v6, %v3185_v42 }
0x18b3   :  { %v2586_v9 = vadd.f32 %v2577_v11, %v4596_v62  ;;  %v3162_v62 = vld [vmem:[%s4979_s9 + $0x20] sm:$0xff] }
0x18b4   :  { %v2581_v20 = vpop.f32.mrb[40].mxu0  ;;  %v3821_v36 = vpack.c.bf16 %v3163_v35, %v3162_v62  ;;  %v3167_v35 = vld [vmem:[%s4980_s10 + $0x1] ss:$0 sm:$0xff] }
0x18b5   :  { %v2582_v21 = vadd.f32 %v3154_v24, %v2581_v20  ;;  %v3572_v22 = vpop.f32.mrb[41].mxu0  ;;  %v2591_v31 = vsel %vm158_vm6, %v2586_v9, 0.0  ;;  %v3179_v24 = vld [vmem:[%s4981_s11 + $0xc0] sm:$0xff] }
0x18b6   :  { %2592 = vadd.xlane.f32.xlu1 %v2591_v31  ;;  %3822 = vmatpush3.bf16.msra.mxu1 %v3821_v36  ;;  %v3839_v61 = vpack.c.bf16 %v3180_v60, %v3179_v24  ;;  %v2925_v60 = vld [vmem:[%s4985_s15 + $0x10] sm:$0xff] }
0x18b7   :  { %v2587_v25 = vadd.f32 %v2582_v21, %v4601_v1  ;;  %v3164_v1 = vld [vmem:[%s4979_s9 + $0x30] sm:$0xff]  ;;  %3823 = vmatprep.subr.bf16.mxu1 %v4072_v49 }
0x18b8   :  { %v3824_v29 = vpack.c.bf16 %v3165_v28, %v3164_v1 }
0x18b9   :  { %v2594_v23 = vsel %vm1221_vm0, %v2587_v25, 0.0 }
0x18ba   :  { %2595 = vadd.xlane.f32.xlu0 %v2594_v23  ;;  %3825 = vmatpush3.bf16.msra.mxu1 %v3824_v29 }
0x18bb   :  { %3826 = vmatprep.subr.bf16.mxu1 %v4072_v49 }
0x18be   :  { %2607 = vadd.xlane.f32.xlu0 %v2606_v34 }
0x1943   :  { %v2593_v30 = vpop.xlane.xlu1 %2592 }
0x1944   :  { %v2598_v32 = vmul.f32 0.03125, %v2593_v30 }
0x1946   :  { %v4815_v27 = vsub.f32 %v2586_v9, %v2598_v32 }
0x1947   :  { %v2596_v39 = vpop.xlane.xlu0 %2595 }
0x1948   :  { %v2599_v41 = vmul.f32 0.03125, %v2596_v39  ;;  %v2604_v43 = vmul.f32 %v4815_v27, %v4815_v27 }
0x194a   :  { %v4819_v44 = vsub.f32 %v2587_v25, %v2599_v41  ;;  %v2609_v46 = vsel %vm158_vm6, %v2604_v43, 0.0 }
0x194b   :  { %v2608_v48 = vpop.xlane.xlu0 %2607  ;;  %2610 = vadd.xlane.f32.xlu1 %v2609_v46 }
0x194c   :  { %v2615_v50 = vmul.f32 0.03125, %v2608_v48  ;;  %v2605_v13 = vmul.f32 %v4819_v44, %v4819_v44  ;;  %v3188_v48 = vld [vmem:[%s4982_s12 + $0x1] ss:$0 sm:$0xff] }
0x194e   :  { %v2618_v15 = vadd.f32 1e-05, %v2615_v50  ;;  %v2612_v19 = vsel %vm1221_vm0, %v2605_v13, 0.0 }
0x194f   :  { %2613 = vadd.xlane.f32.xlu0 %v2612_v19 }
0x1950   :  { %4007 = vrsqrt.f32 %v2618_v15 }
0x195a   :  { %v4008_v63 = vpop.eup %4007 }
0x195b   :  { %v2624_v52 = vmul.f32 %v4008_v63, %v2600_v45 }
0x195d   :  { %v2635_v37 = vmul.f32 %v3159_v26, %v2624_v52 }
0x195f   :  { %v4831_v38 = vadd.f32 %v3161_v53, %v2635_v37 }
0x1961   :  { %3582 = vmatmul.mubr.msk.f32.vlgmr.msra.gmra.mrb[28].mxu1 %vm158_vm6, %v4831_v38 }
0x1962   :  { %3584 = vmatprep.mubr.msk.f32.mxu1 %vm4073_vm13, %v4068_v17  ;;  %3828 = vmatpush3.bf16.msra.mxu1 %v3827_v16 }
0x1963   :  { %3829 = vmatprep.subr.bf16.mxu1 %v4072_v49 }
0x1966   :  { %3831 = vmatpush3.bf16.msra.mxu1 %v3830_v59 }
0x1967   :  { %3832 = vmatprep.subr.bf16.mxu1 %v4072_v49 }
0x196a   :  { %3834 = vmatpush3.bf16.msra.mxu1 %v3833_v5 }
0x196b   :  { %3835 = vmatprep.subr.bf16.mxu1 %v4072_v49 }
0x196e   :  { %3837 = vmatpush3.bf16.msra.mxu1 %v3836_v10  ;;  %v2924_v10 = vld [vmem:[%s4985_s15 + $0x8] sm:$0xff] }
0x196f   :  { %3838 = vmatprep.subr.bf16.mxu1 %v4072_v49  ;;  %v3851_v24 = vpack.c.bf16 %v2924_v10, %v2923_v14 }
0x1971   :  { %3852 = vmatpush3.bf16.msra.mxu0 %v3851_v24 }
0x1972   :  { %3840 = vmatpush3.bf16.msra.mxu1 %v3839_v61  ;;  %3853 = vmatprep.subr.bf16.mxu0 %v4072_v49  ;;  %v2926_v61 = vld [vmem:[%s4985_s15 + $0x18] sm:$0xff] }
0x1973   :  { %3841 = vmatprep.subr.bf16.mxu1 %v4072_v49  ;;  %v3854_v56 = vpack.c.bf16 %v2926_v61, %v2925_v60 }
0x1975   :  { %3855 = vmatpush3.bf16.msra.mxu0 %v3854_v56 }
0x1976   :  { %3843 = vmatpush3.bf16.msra.mxu1 %v3842_v0 }
0x1977   :  { %3844 = vmatprep.subr.bf16.mxu1 %v4072_v49 }
0x197a   :  { %3846 = vmatpush3.bf16.msra.mxu1 %v3845_v18 }
0x197b   :  { %3847 = vmatprep.subr.bf16.mxu1 %v4072_v49 }
0x197e   :  { %3849 = vmatpush3.bf16.msra.mxu1 %v3848_v8 }
0x19d8   :  { %v2611_v55 = vpop.xlane.xlu1 %2610 }
0x19d9   :  { %v2616_v11 = vmul.f32 0.03125, %v2611_v55 }
0x19db   :  { %v2619_v12 = vadd.f32 1e-05, %v2616_v11 }
0x19dc   :  { %v2614_v9 = vpop.xlane.xlu0 %2613 }
0x19dd   :  { %4009 = vrsqrt.f32 %v2619_v12  ;;  %v2617_v20 = vmul.f32 0.03125, %v2614_v9 }
0x19df   :  { %v2620_v45 = vadd.f32 1e-05, %v2617_v20 }
0x19e1   :  { %4011 = vrsqrt.f32 %v2620_v45  ;;  %v3190_v45 = vld [vmem:[%s4983_s13 + $0x1] ss:$0 sm:$0xff] }
0x19e7   :  { %v4010_v21 = vpop.eup %4009 }
0x19e8   :  { %v2625_v22 = vmul.f32 %v4010_v21, %v4815_v27 }
0x19ea   :  { %v2636_v31 = vmul.f32 %v3159_v26, %v2625_v22  ;;  %v3192_v22 = vld [vmem:[%s4984_s14 + $0x1] ss:$0 sm:$0xff] }
0x19eb   :  { %v4012_v25 = vpop.eup %4011 }
0x19ec   :  { %v2647_v23 = vadd.f32 %v3161_v53, %v2636_v31  ;;  %v2626_v33 = vmul.f32 %v4012_v25, %v4819_v44 }
0x19ee   :  { %3585 = vmatmul.mubr.msk.f32.gmra.mrb[30].mxu1 %vm158_vm6, %v2647_v23  ;;  %v2637_v34 = vmul.f32 %v3159_v26, %v2626_v33 }
0x19ef   :  { %3587 = vmatprep.mubr.msk.f32.mxu1 %vm4073_vm13, %v4068_v17 }
0x19f0   :  { %v2648_v62 = vadd.f32 %v3161_v53, %v2637_v34 }
0x19f2   :  { %3588 = vmatmul.mubr.msk.f32.gmra.mrb[32].mxu1 %vm158_vm6, %v2648_v62 }
0x19f3   :  { %3622 = vmatprep.mubr.msk.f32.mxu1 %vm4073_vm13, %v4068_v17 }
0x1a34   :  { %v2737_v36 = vpop.f32.mrb[28].mxu1 }
0x1a35   :  { %v2738_v1 = vadd.f32 %v3167_v35, %v2737_v36  ;;  %v3583_v28 = vpop.f32.mrb[29].mxu1 }
0x1a37   :  { %v2751_v29 = vmax.f32 %v2738_v1, 0.0 }
0x1a39   :  { %3623 = vmatmul.mubr.f32.vlgmr.msra.gmra.mrb[34].mxu1 %v2751_v29 }
0x1a3a   :  { %3625 = vmatprep.mubr.msk.f32.mxu1 %vm4073_vm13, %v4068_v17 }
0x1ac1   :  { %v2742_v30 = vpop.f32.mrb[30].mxu1 }
0x1ac2   :  { %v2743_v32 = vadd.f32 %v3167_v35, %v2742_v30  ;;  %v3586_v27 = vpop.f32.mrb[31].mxu1 }
0x1ac4   :  { %v2752_v39 = vmax.f32 %v2743_v32, 0.0 }
0x1ac5   :  { %v2747_v41 = vpop.f32.mrb[32].mxu1 }
0x1ac6   :  { %v2748_v43 = vadd.f32 %v3167_v35, %v2747_v41  ;;  %v3589_v44 = vpop.f32.mrb[33].mxu1  ;;  %3626 = vmatmul.mubr.f32.gmra.mrb[36].mxu1 %v2752_v39 }
0x1ac7   :  { %3628 = vmatprep.mubr.msk.f32.mxu1 %vm4073_vm13, %v4068_v17 }
0x1ac8   :  { %v2753_v46 = vmax.f32 %v2748_v43, 0.0  ;;  %v3193_v43 = vld [vmem:[%s4986_s16] ss:$0 sm:$0xff] }
0x1aca   :  { %3629 = vmatmul.mubr.f32.gmra.mrb[38].mxu1 %v2753_v46 }
0x1b0c   :  { %v2845_v50 = vpop.f32.mrb[34].mxu1 }
0x1b0d   :  { %v2846_v13 = vadd.f32 %v3188_v48, %v2845_v50  ;;  %v3624_v15 = vpop.f32.mrb[35].mxu1 }
0x1b0f   :  { %v2859_v19 = vadd.f32 %v2846_v13, %v4831_v38 }
0x1b11   :  { %v2862_v63 = vsel %vm158_vm6, %v2859_v19, 0.0 }
0x1b12   :  { %2863 = vadd.xlane.f32.xlu1 %v2862_v63 }
0x1b99   :  { %v2850_v26 = vpop.f32.mrb[36].mxu1 }
0x1b9a   :  { %v2851_v52 = vadd.f32 %v3188_v48, %v2850_v26  ;;  %v3627_v53 = vpop.f32.mrb[37].mxu1 }
0x1b9c   :  { %v2860_v37 = vadd.f32 %v2851_v52, %v2647_v23 }
0x1b9d   :  { %v2855_v47 = vpop.f32.mrb[38].mxu1 }
0x1b9e   :  { %v2856_v40 = vadd.f32 %v3188_v48, %v2855_v47  ;;  %v3630_v57 = vpop.f32.mrb[39].mxu1  ;;  %v2865_v16 = vsel %vm158_vm6, %v2860_v37, 0.0 }
0x1b9f   :  { %v2864_v58 = vpop.xlane.xlu1 %2863  ;;  %2866 = vadd.xlane.f32.xlu0 %v2865_v16 }
0x1ba0   :  { %v2871_v59 = vmul.f32 0.03125, %v2864_v58  ;;  %v2861_v51 = vadd.f32 %v2856_v40, %v2648_v62 }
0x1ba2   :  { %v2874_v3 = vsub.f32 %v2859_v19, %v2871_v59  ;;  %v2868_v5 = vsel %vm1221_vm0, %v2861_v51, 0.0 }
0x1ba3   :  { %2869 = vadd.xlane.f32.xlu1 %v2868_v5 }
0x1ba4   :  { %v2877_v38 = vmul.f32 %v2874_v3, %v2874_v3 }
0x1ba6   :  { %v2880_v7 = vsel %vm158_vm6, %v2877_v38, 0.0 }
0x1ba7   :  { %2881 = vadd.xlane.f32.xlu0 %v2880_v7 }
0x1c2c   :  { %v2867_v54 = vpop.xlane.xlu0 %2866 }
0x1c2d   :  { %v2872_v0 = vmul.f32 0.03125, %v2867_v54 }
0x1c2f   :  { %v2875_v2 = vsub.f32 %v2860_v37, %v2872_v0 }
0x1c30   :  { %v2870_v4 = vpop.xlane.xlu1 %2869 }
0x1c31   :  { %v2873_v18 = vmul.f32 0.03125, %v2870_v4  ;;  %v2878_v42 = vmul.f32 %v2875_v2, %v2875_v2 }
0x1c33   :  { %v2876_v6 = vsub.f32 %v2861_v51, %v2873_v18  ;;  %v2883_v8 = vsel %vm158_vm6, %v2878_v42, 0.0 }
0x1c34   :  { %v2882_v49 = vpop.xlane.xlu0 %2881  ;;  %2884 = vadd.xlane.f32.xlu1 %v2883_v8 }
0x1c35   :  { %v2889_v55 = vmul.f32 0.03125, %v2882_v49  ;;  %v2879_v11 = vmul.f32 %v2876_v6, %v2876_v6 }
0x1c37   :  { %v2892_v12 = vadd.f32 1e-05, %v2889_v55  ;;  %v2886_v9 = vsel %vm1221_vm0, %v2879_v11, 0.0 }
0x1c38   :  { %2887 = vadd.xlane.f32.xlu0 %v2886_v9 }
0x1c39   :  { %4013 = vrsqrt.f32 %v2892_v12 }
0x1c43   :  { %v4014_v20 = vpop.eup %4013 }
0x1c44   :  { %v2898_v21 = vmul.f32 %v4014_v20, %v2874_v3 }
0x1c46   :  { %v2909_v31 = vmul.f32 %v3190_v45, %v2898_v21 }
0x1c48   :  { %v2920_v25 = vadd.f32 %v3192_v22, %v2909_v31 }
0x1c4a   :  { %3640 = vmatmul.mubr.msk.f32.vlgmr.msra.gmra.mrb[42].mxu0 %vm158_vm6, %v2920_v25 }
0x1c4b   :  { %3642 = vmatprep.mubr.msk.f32.mxu0 %vm4073_vm13, %v4068_v17 }
0x1cc1   :  { %v2885_v23 = vpop.xlane.xlu1 %2884 }
0x1cc2   :  { %v2890_v33 = vmul.f32 0.03125, %v2885_v23 }
0x1cc4   :  { %v2893_v34 = vadd.f32 1e-05, %v2890_v33 }
0x1cc5   :  { %v2888_v62 = vpop.xlane.xlu0 %2887 }
0x1cc6   :  { %4015 = vrsqrt.f32 %v2893_v34  ;;  %v2891_v35 = vmul.f32 0.03125, %v2888_v62 }
0x1cc8   :  { %v2894_v36 = vadd.f32 1e-05, %v2891_v35 }
0x1cca   :  { %4017 = vrsqrt.f32 %v2894_v36 }
0x1cd0   :  { %v4016_v1 = vpop.eup %4015 }
0x1cd1   :  { %v2899_v28 = vmul.f32 %v4016_v1, %v2875_v2 }
0x1cd3   :  { %v2910_v29 = vmul.f32 %v3190_v45, %v2899_v28 }
0x1cd4   :  { %v4018_v30 = vpop.eup %4017 }
0x1cd5   :  { %v2921_v32 = vadd.f32 %v3192_v22, %v2910_v29  ;;  %v2900_v27 = vmul.f32 %v4018_v30, %v2876_v6 }
0x1cd7   :  { %3643 = vmatmul.mubr.msk.f32.gmra.mrb[44].mxu0 %vm158_vm6, %v2921_v32  ;;  %v2911_v39 = vmul.f32 %v3190_v45, %v2900_v27 }
0x1cd8   :  { %3645 = vmatprep.mubr.msk.f32.mxu0 %vm4073_vm13, %v4068_v17 }
0x1cd9   :  { %v2922_v41 = vadd.f32 %v3192_v22, %v2911_v39 }
0x1cdb   :  { %3646 = vmatmul.mubr.msk.f32.gmra.mrb[46].mxu0 %vm158_vm6, %v2922_v41 }
0x1d1d   :  { %v3009_v44 = vpop.f32.mrb[42].mxu0 }
0x1d1e   :  { %v3010_v46 = vadd.f32 %v3193_v43, %v3009_v44  ;;  %v3641_v48 = vpop.f32.mrb[43].mxu0 }
0x1d20   :  { %3023 = vst [vmem:[#allocation3] sm:$0xff] %v3010_v46 }
0x1d21   :  { %4030 = shalt.err (!%p4027_p4)
}
0x1d22   :  { %s4031_s21 = scalar_lea.hbm %s4988_s18, 384 }
0x1d23   :  { %p4032_p5 = scmp.ne.s32.totalorder %s4988_s18, %s4031_s21  ;;  %p4035_p6 = scmp.lt.u32.totalorder %s4031_s21, %s4988_s18 }
0x1d25   :  { %p4037_p7 = pnand %p4035_p6, %p4032_p5 }
0x1d27   :  { %4040 = shalt.err (!%p4037_p7)
}
0x1d28   :  { %s4075_s3 = smov 128   ;;  %s4076_s11 = smov 8  }
0x1d29   :  { %3049 = dma.vmem_to_hbm [thread:$0]  %s3044_s1, 384, %s4988_s18, [#allocation6], %s4075_s3, %s4075_s3, %s4076_s11  }
0x1d2a   :  { %s4077_s29 = smov [#allocation3]  }
0x1d2b   :  { %s3031_s12 = sshll.u32 %s4077_s29, 4  ;;  %s3032_s12 = int_to_ptr.vmem [resolvable:$true] %s3031_s12 }
0x1d2c   :  { %s4041_s28 = scalar_lea.vmem %s3032_s12, 384  ;;  %p4046_p9 = scmp.lt.s32.totalorder %s3032_s12, %s3032_s12 }
0x1d2d   :  { %p4042_p8 = scmp.ne.s32.totalorder %s3032_s12, %s4041_s28  ;;  %p4047_p10 = scmp.lt.s32.totalorder %s4041_s28, %s4041_s28 }
0x1d2f   :  { %p4048_p11 = por %p4047_p10, %p4046_p9 }
0x1d31   :  { %p4049_p12 = pnand %p4048_p11, %p4042_p8 }
0x1daa   :  { %v3014_v17 = vpop.f32.mrb[44].mxu0 }
0x1dab   :  { %v3015_v50 = vadd.f32 %v3193_v43, %v3014_v17  ;;  %v3644_v13 = vpop.f32.mrb[45].mxu0 }
0x1dad   :  { %3024 = vst [vmem:[#allocation3 + $0x8] sm:$0xff] %v3015_v50 }
0x1dae   :  { %v3019_v15 = vpop.f32.mrb[46].mxu0 }
0x1daf   :  { %v3020_v19 = vadd.f32 %v3193_v43, %v3019_v15  ;;  %v3647_v63 = vpop.f32.mrb[47].mxu0 }
0x1db1   :  { %3025 = vst [vmem:[#allocation3 + $0x10] sm:$0x3] %v3020_v19 }
0x1db2   :  { %4052 = shalt.err (!%p4049_p12)
}
0x1db3   :  { %s4053_s23 = scalar_lea.hbm %s4987_s17, 384 }
0x1db4   :  { %p4054_p13 = scmp.ne.s32.totalorder %s4987_s17, %s4053_s23  ;;  %p4057_p0 = scmp.lt.u32.totalorder %s4053_s23, %s4987_s17 }
0x1db6   :  { %p4059_p1 = pnand %p4057_p0, %p4054_p13 }
0x1db8   :  { %4062 = shalt.err (!%p4059_p1)
}
0x1db9   :  { %3037 = dma.vmem_to_hbm [thread:$0]  %s3032_s12, 384, %s4987_s17, [#allocation4], %s4075_s3, %s4075_s3, %s4076_s11  }
0x1dba   :  { %4063 = dma.done.wait [#allocation4], 384  }
0x1dbb   :  { %4064 = vsyncadd [#allocation4], 4294966912 }
0x1dbc   :  { %4065 = dma.done.wait [#allocation6], 384  }
0x1dbd   :  { %4066 = vsyncadd [#allocation6], 4294966912 }
0x1dbe   :  { %3056 = vsyncpa [#allocation4], 1 }
0x1dbf   :  { %3057 = vsyncpa [#allocation6], 1 }

</bundles_post_ra>
